<compile_context>
chip_gen: v5e
topology: v5e:2x2
jax: 0.10.0
libtpu: 0.0.40
codegen_flags: <defaults>
</compile_context>

<pallas_src>
import jax
import jax.numpy as jnp
from jax.experimental import pallas as pl
from jax.experimental.pallas import tpu as pltpu


NEG_BIG = -1e30  # drives padded logits to ~-inf without creating NaN/Inf math


# --------------------------------------------------------------------------- #
# Kernel
# --------------------------------------------------------------------------- #
def classifier_kernel(x_ref, w1_ref, b1_ref, w2_ref, b2_ref, wo_ref, bo_ref,
                      out_ref, acc_ref):
    """Grid = (batch tile i, layer-1 K block k).

    x_ref  : (TB, TK)     f32 flattened-input block (cast to bf16 in-kernel)
    w1_ref : (TK, H1)     bf16, streamed over k
    b*/w*  : VMEM-resident bf16 weights / f32 biases (constant index_map)
    out_ref: (TB, O_pad)  f32 log-probabilities (padded class lanes ~ -inf)
    acc_ref: (TB, H1)     f32 layer-1 accumulator scratch
    """
    k = pl.program_id(1)

    @pl.when(k == 0)
    def _():
        acc_ref[...] = jnp.zeros_like(acc_ref)

    # Layer 1 partial product: bf16 into the MXU, f32 accumulation.
    acc_ref[...] += jnp.dot(x_ref[...].astype(jnp.bfloat16), w1_ref[...],
                            preferred_element_type=jnp.float32)

    @pl.when(k == pl.num_programs(1) - 1)
    def _():
        # Bias + ReLU in f32 on the VPU (safe on v5e: no bf16 VPU path).
        h = jnp.maximum(acc_ref[...] + b1_ref[...], 0.0)
        # Dropout is identity at inference.

        # Hidden layer 2.
        h = jnp.dot(h.astype(jnp.bfloat16), w2_ref[...],
                    preferred_element_type=jnp.float32)
        h = jnp.maximum(h + b2_ref[...], 0.0)

        # Output layer (class axis padded to a lane-dense 128 multiple).
        z = jnp.dot(h.astype(jnp.bfloat16), wo_ref[...],
                    preferred_element_type=jnp.float32)
        z = z + bo_ref[...]          # padded lanes: bias = -1e30 -> exp() == 0

        # Numerically stable log_softmax along the class axis.
        m = jnp.max(z, axis=-1, keepdims=True)
        e = jnp.exp(z - m)
        lse = m + jnp.log(jnp.sum(e, axis=-1, keepdims=True))
        out_ref[...] = (z - lse).astype(out_ref.dtype)


# --------------------------------------------------------------------------- #
# Tiling helpers
# --------------------------------------------------------------------------- #
def _cdiv(a, b):
    return -(-a // b)


def _round_up(n, m):
    return _cdiv(n, m) * m


def _vmem_budget_bytes(frac=0.85, fallback_cap=64 * 1024 * 1024):
    """Generation-aware VMEM budget: ~109 MiB on v5e/v6e (128 MiB VMEM),
    ~54 MiB on v7x (64 MiB per TensorCore).  Falls back to the conservative
    v7x figure if the hardware query is unavailable."""
    cap = None
    try:
        cap = getattr(pltpu.get_tpu_info(), "vmem_capacity_bytes", None)
    except Exception:
        cap = None
    if not cap:
        cap = fallback_cap
    return int(cap * frac)


def _choose_k_tile(F, H1, H2, O_pad, TB, budget):
    """Largest multiple-of-128 K block such that the kernel's VMEM estimate
    (resident weights + accumulator + double-buffered x / w1 blocks) fits."""
    resident = (H1 * H2 + H2 * O_pad) * 2 + (H1 + H2 + O_pad) * 4  # bf16 w + f32 b
    fixed = TB * H1 * 4 + 2 * TB * O_pad * 4                       # acc + out bufs
    avail = budget - resident - fixed
    per_k = 2 * TB * 4 + 2 * H1 * 2        # 2x f32 x-block rows + 2x bf16 w1 rows
    tk = avail // per_k if avail > 0 else 128
    tk = max(128, (tk // 128) * 128)
    return int(min(tk, _round_up(F, 128)))


def _pick_batch_tile(B, max_batch_tile):
    """Batch tile rounded to 16 (bf16 sublane packing) with bounded padding
    waste.  Use >=2 tiles whenever each tile would still hold real rows so the
    'parallel' grid axis can feed both v7x TensorCores."""
    min_tiles = 2 if B >= 32 else 1
    tiles = max(min_tiles, _cdiv(B, max_batch_tile))
    TB = _round_up(_cdiv(B, tiles), 16)
    B_pad = _round_up(B, TB)
    return TB, B_pad


# --------------------------------------------------------------------------- #
# One-time parameter preparation (hoisted out of the per-call path)
# --------------------------------------------------------------------------- #
def prepare_params(params, *, max_batch_tile=256, max_k_tile=None,
                   vmem_budget=None):
    """bf16 weight casts, class padding (O -> multiple of 128, -1e30 bias in the
    padded lanes) and the K-pad of w1.  Doing this per call would re-read and
    re-write every weight in HBM (dominant cost for the 25088x4096 config)."""
    w1, b1, w2, b2, wo, bo = params
    F, H1 = w1.shape
    H2, O = wo.shape

    O_pad = _round_up(O, 128)
    if vmem_budget is None:
        vmem_budget = _vmem_budget_bytes()

    TK = _choose_k_tile(F, H1, H2, O_pad, max_batch_tile, vmem_budget)
    if max_k_tile is not None:
        TK = min(TK, max(128, _round_up(max_k_tile, 128)))
    TK = min(TK, _round_up(F, 128))
    F_pad = _round_up(F, TK)

    w1p = jnp.pad(w1, ((0, F_pad - F), (0, 0))).astype(jnp.bfloat16)
    w2b = w2.astype(jnp.bfloat16)
    wop = jnp.pad(wo, ((0, 0), (0, O_pad - O))).astype(jnp.bfloat16)
    b1f = b1.astype(jnp.float32)
    b2f = b2.astype(jnp.float32)
    bof = jnp.pad(bo.astype(jnp.float32), ((0, 0), (0, O_pad - O)),
                  constant_values=NEG_BIG)

    meta = dict(F=F, F_pad=F_pad, TK=TK, H1=H1, H2=H2, O=O, O_pad=O_pad,
                max_batch_tile=max_batch_tile, vmem_budget=int(vmem_budget))
    return (w1p, b1f, w2b, b2f, wop, bof), meta


# --------------------------------------------------------------------------- #
# Forward wrapper
# --------------------------------------------------------------------------- #
def classifier_forward(x, prepared, meta):
    """Flatten NCHW -> (B, F), pad batch / F, launch the tiled kernel."""
    w1p, b1f, w2b, b2f, wop, bof = prepared
    F, F_pad, TK = meta["F"], meta["F_pad"], meta["TK"]
    H1, H2, O, O_pad = meta["H1"], meta["H2"], meta["O"], meta["O_pad"]

    B = x.shape[0]
    x2d = x.reshape(B, -1)                        # x.view(B, -1)
    if x2d.shape[1] != F:
        raise ValueError(f"flattened input size {x2d.shape[1]} != {F}")
    x2d = x2d.astype(jnp.float32)                 # bf16 cast happens in-kernel

    TB, B_pad = _pick_batch_tile(B, meta["max_batch_tile"])
    num_tiles = B_pad // TB
    num_k = F_pad // TK
    x2d = jnp.pad(x2d, ((0, B_pad - B), (0, F_pad - F)))

    flops = 2 * B_pad * (F_pad * H1 + H1 * H2 + H2 * O_pad)
    bytes_accessed = (
        x2d.size * 4 + B_pad * O_pad * 4
        + num_tiles * w1p.size * 2            # w1 re-streamed per batch tile
        + (w2b.size + wop.size) * 2
        + (b1f.size + b2f.size + bof.size) * 4)

    def build(single_buffer_weights):
        def resident(shape):
            # Constant index_map => block fetched once and revisited every step.
            # Buffered(1) drops the useless second buffer (halves weight VMEM).
            if single_buffer_weights and hasattr(pl, "Buffered"):
                return pl.BlockSpec(shape, lambda i, k: (0, 0),
                                    pipeline_mode=pl.Buffered(1))
            return pl.BlockSpec(shape, lambda i, k: (0, 0))

        in_specs = [
            pl.BlockSpec((TB, TK), lambda i, k: (i, k)),   # x: batch + K streamed
            pl.BlockSpec((TK, H1), lambda i, k: (k, 0)),   # w1: K streamed
            resident((1, H1)),                             # b1
            resident((H1, H2)),                            # w2
            resident((1, H2)),                             # b2
            resident((H2, O_pad)),                         # wo
            resident((1, O_pad)),                          # bo
        ]
        out_spec = pl.BlockSpec((TB, O_pad), lambda i, k: (i, 0))

        return pl.pallas_call(
            classifier_kernel,
            out_shape=jax.ShapeDtypeStruct((B_pad, O_pad), jnp.float32),
            grid=(num_tiles, num_k),
            in_specs=in_specs,
            out_specs=out_spec,
            scratch_shapes=[pltpu.VMEM((TB, H1), jnp.float32)],
            compiler_params=pltpu.CompilerParams(
                dimension_semantics=("parallel", "arbitrary"),
                vmem_limit_bytes=meta["vmem_budget"],
            ),
            cost_estimate=pl.CostEstimate(
                flops=flops,
                transcendentals=B_pad * O_pad + B_pad,   # exp per logit + log/row
                bytes_accessed=bytes_accessed,
            ),
        )

    args = (x2d, w1p, b1f, w2b, b2f, wop, bof)
    try:
        out = build(True)(*args)
    except Exception:
        # Fallback for JAX builds where pl.Buffered(1) is rejected: default
        # (double-buffered) resident weights — identical results, more VMEM.
        out = build(False)(*args)

    # Strip batch padding (garbage rows) and class padding (~-inf lanes).
    # (Output kept f32; bf16 output is possible if the consumer tolerates it.)
    return out[:B, :O]


# --------------------------------------------------------------------------- #
# Parameters + pure-JAX reference
# --------------------------------------------------------------------------- #
def init_params(key, input_size, hidden_layers, output_size):
    """Deterministic synthetic parameter init (shapes match nn.Linear)."""
    sizes = [input_size] + list(hidden_layers) + [output_size]
    params = []
    keys = jax.random.split(key, len(sizes) - 1)
    for k, fan_in, fan_out in zip(keys, sizes[:-1], sizes[1:]):
        kw, kb = jax.random.split(k)
        bound = 1.0 / jnp.sqrt(fan_in)
        # stored as (in, out) so the kernel computes x @ W + b
        w = jax.random.uniform(kw, (fan_in, fan_out), jnp.float32, -bound, bound)
        b = jax.random.uniform(kb, (1, fan_out), jnp.float32, -bound, bound)
        params.extend([w, b])
    return tuple(params)


def reference_forward(x, params):
    """Pure-JAX reference with the same bf16-matmul / f32-accumulate recipe."""
    w1, b1, w2, b2, wo, bo = params
    h = x.reshape(x.shape[0], -1).astype(jnp.bfloat16)
    h = jnp.maximum(jnp.dot(h, w1.astype(jnp.bfloat16),
                            preferred_element_type=jnp.float32) + b1, 0.0)
    h = jnp.maximum(jnp.dot(h.astype(jnp.bfloat16), w2.astype(jnp.bfloat16),
                            preferred_element_type=jnp.float32) + b2, 0.0)
    z = jnp.dot(h.astype(jnp.bfloat16), wo.astype(jnp.bfloat16),
                preferred_element_type=jnp.float32) + bo
    return jax.nn.log_softmax(z, axis=-1)


# --------------------------------------------------------------------------- #
# Self-test
# --------------------------------------------------------------------------- #
if __name__ == "__main__":
    # Small, shape-consistent configuration of the module:
    #   flattened input_size = 8*8*8 = 512, hidden = [256, 128], output = 102
    C, H, W = 8, 8, 8
    input_size = C * H * W
    hidden = [256, 128]
    output_size = 102

    key = jax.random.PRNGKey(0)
    kx, kp = jax.random.split(key)
    params = init_params(kp, input_size, hidden, output_size)

    # max_k_tile=256 forces two K blocks so the layer-1 reduction grid path is
    # exercised even at this small F=512 (production F=25088 streams many).
    prepared, meta = prepare_params(params, max_batch_tile=256, max_k_tile=256)

    for B in (37, 2):   # multi-tile batch (2 parallel tiles) and tiny batch
        x = jax.random.normal(kx, (B, C, H, W), dtype=jnp.float32)  # NCHW
        out = classifier_forward(x, prepared, meta)
        jax.block_until_ready(out)

        ref = reference_forward(x, params)
        assert out.shape == (B, output_size)
        # log-probs over the real 102 classes should sum (in prob space) to ~1
        assert jnp.allclose(jnp.exp(out).sum(axis=1), 1.0, atol=1e-3)
        assert jnp.allclose(out, ref, atol=2e-2), float(jnp.abs(out - ref).max())

    print("KERNEL_OK")
</pallas_src>

<mosaic_0001>
module attributes {stable_mosaic.version = 11 : i64} {
  func.func @classifier_kernel(%arg0: i32, %arg1: i32, %arg2: memref<32x256xf32, #tpu.memory_space<vmem>>, %arg3: memref<256x256xbf16, #tpu.memory_space<vmem>>, %arg4: memref<1x256xf32, #tpu.memory_space<vmem>>, %arg5: memref<256x128xbf16, #tpu.memory_space<vmem>>, %arg6: memref<1x128xf32, #tpu.memory_space<vmem>>, %arg7: memref<128x128xbf16, #tpu.memory_space<vmem>>, %arg8: memref<1x128xf32, #tpu.memory_space<vmem>>, %arg9: memref<32x128xf32, #tpu.memory_space<vmem>>, %arg10: memref<32x256xf32, #tpu.memory_space<vmem>>) attributes {dimension_semantics = [#tpu.dimension_semantics<parallel>, #tpu.dimension_semantics<arbitrary>], iteration_bounds = array<i64: 2, 2>, scalar_prefetch = 0 : i64, scratch_operands = 1 : i64, tpu.core_type = #tpu.core_type<tc>, window_params = [{transform_indices = @transform_0, window_bounds = array<i64: 32, 256>}, {transform_indices = @transform_1, window_bounds = array<i64: 256, 256>}, {pipeline_mode = #tpu.pipeline_mode<synchronous>, transform_indices = @transform_2, window_bounds = array<i64: 1, 256>}, {pipeline_mode = #tpu.pipeline_mode<synchronous>, transform_indices = @transform_3, window_bounds = array<i64: 256, 128>}, {pipeline_mode = #tpu.pipeline_mode<synchronous>, transform_indices = @transform_4, window_bounds = array<i64: 1, 128>}, {pipeline_mode = #tpu.pipeline_mode<synchronous>, transform_indices = @transform_5, window_bounds = array<i64: 128, 128>}, {pipeline_mode = #tpu.pipeline_mode<synchronous>, transform_indices = @transform_6, window_bounds = array<i64: 1, 128>}, {transform_indices = @transform_7, window_bounds = array<i64: 32, 128>}]} {
    %c0_i32 = arith.constant 0 : i32
    %0 = arith.cmpi eq, %arg1, %c0_i32 : i32
    %1 = arith.extui %0 : i1 to i32
    %c0_i32_0 = arith.constant 0 : i32
    %2 = arith.cmpi ne, %1, %c0_i32_0 : i32
    scf.if %2 {
      %cst_9 = arith.constant 0.000000e+00 : f32
      %13 = vector.broadcast %cst_9 : f32 to vector<32x256xf32>
      %c0_10 = arith.constant 0 : index
      %c0_11 = arith.constant 0 : index
      %14 = vector.load %arg10[%c0_10, %c0_11] : memref<32x256xf32, #tpu.memory_space<vmem>>, vector<32x256xf32>
      tpu.vector_store %arg10[%c0_10, %c0_11], %13 {strides = array<i32>} : memref<32x256xf32, #tpu.memory_space<vmem>>, vector<32x256xf32>,
    } else {
    }
    %c0 = arith.constant 0 : index
    %c0_1 = arith.constant 0 : index
    %3 = vector.load %arg10[%c0, %c0_1] : memref<32x256xf32, #tpu.memory_space<vmem>>, vector<32x256xf32>
    %c0_2 = arith.constant 0 : index
    %c0_3 = arith.constant 0 : index
    %4 = vector.load %arg2[%c0_2, %c0_3] : memref<32x256xf32, #tpu.memory_space<vmem>>, vector<32x256xf32>
    %5 = arith.truncf %4 : vector<32x256xf32> to vector<32x256xbf16>
    %c0_4 = arith.constant 0 : index
    %c0_5 = arith.constant 0 : index
    %6 = vector.load %arg3[%c0_4, %c0_5] : memref<256x256xbf16, #tpu.memory_space<vmem>>, vector<256x256xbf16>
    %cst = arith.constant dense<0.000000e+00> : vector<32x256xf32>
    %7 = tpu.matmul %5, %6, %cst {dimension_numbers = #tpu.dot_dimension_numbers<[1], [0], [0], [1], [0, 0, 1, 1], [], []>} : vector<32x256xbf16>, vector<256x256xbf16>, vector<32x256xf32> -> vector<32x256xf32>
    %8 = arith.addf %3, %7 : vector<32x256xf32>
    %c0_6 = arith.constant 0 : index
    %c0_7 = arith.constant 0 : index
    %9 = vector.load %arg10[%c0_6, %c0_7] : memref<32x256xf32, #tpu.memory_space<vmem>>, vector<32x256xf32>
    tpu.vector_store %arg10[%c0_6, %c0_7], %8 {strides = array<i32>} : memref<32x256xf32, #tpu.memory_space<vmem>>, vector<32x256xf32>,
    %c1_i32 = arith.constant 1 : i32
    %10 = arith.cmpi eq, %arg1, %c1_i32 : i32
    %11 = arith.extui %10 : i1 to i32
    %c0_i32_8 = arith.constant 0 : i32
    %12 = arith.cmpi ne, %11, %c0_i32_8 : i32
    scf.if %12 {
      %c0_9 = arith.constant 0 : index
      %c0_10 = arith.constant 0 : index
      %13 = vector.load %arg10[%c0_9, %c0_10] : memref<32x256xf32, #tpu.memory_space<vmem>>, vector<32x256xf32>
      %c0_11 = arith.constant 0 : index
      %c0_12 = arith.constant 0 : index
      %14 = vector.load %arg4[%c0_11, %c0_12] : memref<1x256xf32, #tpu.memory_space<vmem>>, vector<1x256xf32>
      %15 = vector.broadcast %14 : vector<1x256xf32> to vector<32x256xf32>
      %16 = arith.addf %13, %15 : vector<32x256xf32>
      %cst_13 = arith.constant 0.000000e+00 : f32
      %17 = vector.broadcast %cst_13 : f32 to vector<32x256xf32>
      %18 = arith.maximumf %16, %17 : vector<32x256xf32>
      %19 = arith.truncf %18 : vector<32x256xf32> to vector<32x256xbf16>
      %c0_14 = arith.constant 0 : index
      %c0_15 = arith.constant 0 : index
      %20 = vector.load %arg5[%c0_14, %c0_15] : memref<256x128xbf16, #tpu.memory_space<vmem>>, vector<256x128xbf16>
      %cst_16 = arith.constant dense<0.000000e+00> : vector<32x128xf32>
      %21 = tpu.matmul %19, %20, %cst_16 {dimension_numbers = #tpu.dot_dimension_numbers<[1], [0], [0], [1], [0, 0, 1, 1], [], []>} : vector<32x256xbf16>, vector<256x128xbf16>, vector<32x128xf32> -> vector<32x128xf32>
      %c0_17 = arith.constant 0 : index
      %c0_18 = arith.constant 0 : index
      %22 = vector.load %arg6[%c0_17, %c0_18] : memref<1x128xf32, #tpu.memory_space<vmem>>, vector<1x128xf32>
      %23 = vector.broadcast %22 : vector<1x128xf32> to vector<32x128xf32>
      %24 = arith.addf %21, %23 : vector<32x128xf32>
      %cst_19 = arith.constant 0.000000e+00 : f32
      %25 = vector.broadcast %cst_19 : f32 to vector<32x128xf32>
      %26 = arith.maximumf %24, %25 : vector<32x128xf32>
      %27 = arith.truncf %26 : vector<32x128xf32> to vector<32x128xbf16>
      %c0_20 = arith.constant 0 : index
      %c0_21 = arith.constant 0 : index
      %28 = vector.load %arg7[%c0_20, %c0_21] : memref<128x128xbf16, #tpu.memory_space<vmem>>, vector<128x128xbf16>
      %cst_22 = arith.constant dense<0.000000e+00> : vector<32x128xf32>
      %29 = tpu.matmul %27, %28, %cst_22 {dimension_numbers = #tpu.dot_dimension_numbers<[1], [0], [0], [1], [0, 0, 1, 1], [], []>} : vector<32x128xbf16>, vector<128x128xbf16>, vector<32x128xf32> -> vector<32x128xf32>
      %c0_23 = arith.constant 0 : index
      %c0_24 = arith.constant 0 : index
      %30 = vector.load %arg8[%c0_23, %c0_24] : memref<1x128xf32, #tpu.memory_space<vmem>>, vector<1x128xf32>
      %31 = vector.broadcast %30 : vector<1x128xf32> to vector<32x128xf32>
      %32 = arith.addf %29, %31 : vector<32x128xf32>
      %cst_25 = arith.constant dense<0xFF800000> : vector<32xf32>
      %33 = vector.multi_reduction <maximumf>, %32, %cst_25 [1] : vector<32x128xf32> to vector<32xf32>
      %34 = vector.shape_cast %33 : vector<32xf32> to vector<32x1xf32>
      %35 = vector.broadcast %34 : vector<32x1xf32> to vector<32x128xf32>
      %36 = arith.subf %32, %35 : vector<32x128xf32>
      %37 = math.exp %36 : vector<32x128xf32>
      %cst_26 = arith.constant dense<0.000000e+00> : vector<32xf32>
      %38 = vector.multi_reduction <add>, %37, %cst_26 [1] : vector<32x128xf32> to vector<32xf32>
      %39 = vector.shape_cast %38 : vector<32xf32> to vector<32x1xf32>
      %40 = math.log %39 : vector<32x1xf32>
      %41 = arith.addf %34, %40 : vector<32x1xf32>
      %42 = vector.broadcast %41 : vector<32x1xf32> to vector<32x128xf32>
      %43 = arith.subf %32, %42 : vector<32x128xf32>
      %c0_27 = arith.constant 0 : index
      %c0_28 = arith.constant 0 : index
      %44 = vector.load %arg9[%c0_27, %c0_28] : memref<32x128xf32, #tpu.memory_space<vmem>>, vector<32x128xf32>
      tpu.vector_store %arg9[%c0_27, %c0_28], %43 {strides = array<i32>} : memref<32x128xf32, #tpu.memory_space<vmem>>, vector<32x128xf32>,
    } else {
    }
    return
  }
  func.func @transform_0(%arg0: i32, %arg1: i32) -> (i32, i32) {
    %c0_i32 = arith.constant 0 : i32
    return %arg0, %arg1 : i32, i32
  }
  func.func @transform_1(%arg0: i32, %arg1: i32) -> (i32, i32) {
    %c0_i32 = arith.constant 0 : i32
    %c0_i32_0 = arith.constant 0 : i32
    return %arg1, %c0_i32 : i32, i32
  }
  func.func @transform_2(%arg0: i32, %arg1: i32) -> (i32, i32) {
    %c0_i32 = arith.constant 0 : i32
    %c0_i32_0 = arith.constant 0 : i32
    %c0_i32_1 = arith.constant 0 : i32
    return %c0_i32, %c0_i32_0 : i32, i32
  }
  func.func @transform_3(%arg0: i32, %arg1: i32) -> (i32, i32) {
    %c0_i32 = arith.constant 0 : i32
    %c0_i32_0 = arith.constant 0 : i32
    %c0_i32_1 = arith.constant 0 : i32
    return %c0_i32, %c0_i32_0 : i32, i32
  }
  func.func @transform_4(%arg0: i32, %arg1: i32) -> (i32, i32) {
    %c0_i32 = arith.constant 0 : i32
    %c0_i32_0 = arith.constant 0 : i32
    %c0_i32_1 = arith.constant 0 : i32
    return %c0_i32, %c0_i32_0 : i32, i32
  }
  func.func @transform_5(%arg0: i32, %arg1: i32) -> (i32, i32) {
    %c0_i32 = arith.constant 0 : i32
    %c0_i32_0 = arith.constant 0 : i32
    %c0_i32_1 = arith.constant 0 : i32
    return %c0_i32, %c0_i32_0 : i32, i32
  }
  func.func @transform_6(%arg0: i32, %arg1: i32) -> (i32, i32) {
    %c0_i32 = arith.constant 0 : i32
    %c0_i32_0 = arith.constant 0 : i32
    %c0_i32_1 = arith.constant 0 : i32
    return %c0_i32, %c0_i32_0 : i32, i32
  }
  func.func @transform_7(%arg0: i32, %arg1: i32) -> (i32, i32) {
    %c0_i32 = arith.constant 0 : i32
    %c0_i32_0 = arith.constant 0 : i32
    return %arg0, %c0_i32 : i32, i32
  }
}

module attributes {stable_mosaic.version = 11 : i64} {
  func.func @classifier_kernel(%arg0: i32, %arg1: i32, %arg2: memref<32x256xf32, #tpu.memory_space<vmem>>, %arg3: memref<256x256xbf16, #tpu.memory_space<vmem>>, %arg4: memref<1x256xf32, #tpu.memory_space<vmem>>, %arg5: memref<256x128xbf16, #tpu.memory_space<vmem>>, %arg6: memref<1x128xf32, #tpu.memory_space<vmem>>, %arg7: memref<128x128xbf16, #tpu.memory_space<vmem>>, %arg8: memref<1x128xf32, #tpu.memory_space<vmem>>, %arg9: memref<32x128xf32, #tpu.memory_space<vmem>>, %arg10: memref<32x256xf32, #tpu.memory_space<vmem>>) attributes {dimension_semantics = [#tpu.dimension_semantics<parallel>, #tpu.dimension_semantics<arbitrary>], iteration_bounds = array<i64: 2, 2>, scalar_prefetch = 0 : i64, scratch_operands = 1 : i64, tpu.core_type = #tpu.core_type<tc>, window_params = [{transform_indices = @transform_0, window_bounds = array<i64: 32, 256>}, {transform_indices = @transform_1, window_bounds = array<i64: 256, 256>}, {pipeline_mode = #tpu.pipeline_mode<synchronous>, transform_indices = @transform_2, window_bounds = array<i64: 1, 256>}, {pipeline_mode = #tpu.pipeline_mode<synchronous>, transform_indices = @transform_3, window_bounds = array<i64: 256, 128>}, {pipeline_mode = #tpu.pipeline_mode<synchronous>, transform_indices = @transform_4, window_bounds = array<i64: 1, 128>}, {pipeline_mode = #tpu.pipeline_mode<synchronous>, transform_indices = @transform_5, window_bounds = array<i64: 128, 128>}, {pipeline_mode = #tpu.pipeline_mode<synchronous>, transform_indices = @transform_6, window_bounds = array<i64: 1, 128>}, {transform_indices = @transform_7, window_bounds = array<i64: 32, 128>}]} {
    %c0_i32 = arith.constant 0 : i32
    %0 = arith.cmpi eq, %arg1, %c0_i32 : i32
    %1 = arith.extui %0 : i1 to i32
    %c0_i32_0 = arith.constant 0 : i32
    %2 = arith.cmpi ne, %1, %c0_i32_0 : i32
    scf.if %2 {
      %cst_9 = arith.constant 0.000000e+00 : f32
      %13 = vector.broadcast %cst_9 : f32 to vector<32x256xf32>
      %c0_10 = arith.constant 0 : index
      %c0_11 = arith.constant 0 : index
      %14 = vector.load %arg10[%c0_10, %c0_11] : memref<32x256xf32, #tpu.memory_space<vmem>>, vector<32x256xf32>
      tpu.vector_store %arg10[%c0_10, %c0_11], %13 {strides = array<i32>} : memref<32x256xf32, #tpu.memory_space<vmem>>, vector<32x256xf32>,
    } else {
    }
    %c0 = arith.constant 0 : index
    %c0_1 = arith.constant 0 : index
    %3 = vector.load %arg10[%c0, %c0_1] : memref<32x256xf32, #tpu.memory_space<vmem>>, vector<32x256xf32>
    %c0_2 = arith.constant 0 : index
    %c0_3 = arith.constant 0 : index
    %4 = vector.load %arg2[%c0_2, %c0_3] : memref<32x256xf32, #tpu.memory_space<vmem>>, vector<32x256xf32>
    %5 = arith.truncf %4 : vector<32x256xf32> to vector<32x256xbf16>
    %c0_4 = arith.constant 0 : index
    %c0_5 = arith.constant 0 : index
    %6 = vector.load %arg3[%c0_4, %c0_5] : memref<256x256xbf16, #tpu.memory_space<vmem>>, vector<256x256xbf16>
    %cst = arith.constant dense<0.000000e+00> : vector<32x256xf32>
    %7 = tpu.matmul %5, %6, %cst {dimension_numbers = #tpu.dot_dimension_numbers<[1], [0], [0], [1], [0, 0, 1, 1], [], []>} : vector<32x256xbf16>, vector<256x256xbf16>, vector<32x256xf32> -> vector<32x256xf32>
    %8 = arith.addf %3, %7 : vector<32x256xf32>
    %c0_6 = arith.constant 0 : index
    %c0_7 = arith.constant 0 : index
    %9 = vector.load %arg10[%c0_6, %c0_7] : memref<32x256xf32, #tpu.memory_space<vmem>>, vector<32x256xf32>
    tpu.vector_store %arg10[%c0_6, %c0_7], %8 {strides = array<i32>} : memref<32x256xf32, #tpu.memory_space<vmem>>, vector<32x256xf32>,
    %c1_i32 = arith.constant 1 : i32
    %10 = arith.cmpi eq, %arg1, %c1_i32 : i32
    %11 = arith.extui %10 : i1 to i32
    %c0_i32_8 = arith.constant 0 : i32
    %12 = arith.cmpi ne, %11, %c0_i32_8 : i32
    scf.if %12 {
      %c0_9 = arith.constant 0 : index
      %c0_10 = arith.constant 0 : index
      %13 = vector.load %arg10[%c0_9, %c0_10] : memref<32x256xf32, #tpu.memory_space<vmem>>, vector<32x256xf32>
      %c0_11 = arith.constant 0 : index
      %c0_12 = arith.constant 0 : index
      %14 = vector.load %arg4[%c0_11, %c0_12] : memref<1x256xf32, #tpu.memory_space<vmem>>, vector<1x256xf32>
      %15 = vector.broadcast %14 : vector<1x256xf32> to vector<32x256xf32>
      %16 = arith.addf %13, %15 : vector<32x256xf32>
      %cst_13 = arith.constant 0.000000e+00 : f32
      %17 = vector.broadcast %cst_13 : f32 to vector<32x256xf32>
      %18 = arith.maximumf %16, %17 : vector<32x256xf32>
      %19 = arith.truncf %18 : vector<32x256xf32> to vector<32x256xbf16>
      %c0_14 = arith.constant 0 : index
      %c0_15 = arith.constant 0 : index
      %20 = vector.load %arg5[%c0_14, %c0_15] : memref<256x128xbf16, #tpu.memory_space<vmem>>, vector<256x128xbf16>
      %cst_16 = arith.constant dense<0.000000e+00> : vector<32x128xf32>
      %21 = tpu.matmul %19, %20, %cst_16 {dimension_numbers = #tpu.dot_dimension_numbers<[1], [0], [0], [1], [0, 0, 1, 1], [], []>} : vector<32x256xbf16>, vector<256x128xbf16>, vector<32x128xf32> -> vector<32x128xf32>
      %c0_17 = arith.constant 0 : index
      %c0_18 = arith.constant 0 : index
      %22 = vector.load %arg6[%c0_17, %c0_18] : memref<1x128xf32, #tpu.memory_space<vmem>>, vector<1x128xf32>
      %23 = vector.broadcast %22 : vector<1x128xf32> to vector<32x128xf32>
      %24 = arith.addf %21, %23 : vector<32x128xf32>
      %cst_19 = arith.constant 0.000000e+00 : f32
      %25 = vector.broadcast %cst_19 : f32 to vector<32x128xf32>
      %26 = arith.maximumf %24, %25 : vector<32x128xf32>
      %27 = arith.truncf %26 : vector<32x128xf32> to vector<32x128xbf16>
      %c0_20 = arith.constant 0 : index
      %c0_21 = arith.constant 0 : index
      %28 = vector.load %arg7[%c0_20, %c0_21] : memref<128x128xbf16, #tpu.memory_space<vmem>>, vector<128x128xbf16>
      %cst_22 = arith.constant dense<0.000000e+00> : vector<32x128xf32>
      %29 = tpu.matmul %27, %28, %cst_22 {dimension_numbers = #tpu.dot_dimension_numbers<[1], [0], [0], [1], [0, 0, 1, 1], [], []>} : vector<32x128xbf16>, vector<128x128xbf16>, vector<32x128xf32> -> vector<32x128xf32>
      %c0_23 = arith.constant 0 : index
      %c0_24 = arith.constant 0 : index
      %30 = vector.load %arg8[%c0_23, %c0_24] : memref<1x128xf32, #tpu.memory_space<vmem>>, vector<1x128xf32>
      %31 = vector.broadcast %30 : vector<1x128xf32> to vector<32x128xf32>
      %32 = arith.addf %29, %31 : vector<32x128xf32>
      %cst_25 = arith.constant dense<0xFF800000> : vector<32xf32>
      %33 = vector.multi_reduction <maximumf>, %32, %cst_25 [1] : vector<32x128xf32> to vector<32xf32>
      %34 = vector.shape_cast %33 : vector<32xf32> to vector<32x1xf32>
      %35 = vector.broadcast %34 : vector<32x1xf32> to vector<32x128xf32>
      %36 = arith.subf %32, %35 : vector<32x128xf32>
      %37 = math.exp %36 : vector<32x128xf32>
      %cst_26 = arith.constant dense<0.000000e+00> : vector<32xf32>
      %38 = vector.multi_reduction <add>, %37, %cst_26 [1] : vector<32x128xf32> to vector<32xf32>
      %39 = vector.shape_cast %38 : vector<32xf32> to vector<32x1xf32>
      %40 = math.log %39 : vector<32x1xf32>
      %41 = arith.addf %34, %40 : vector<32x1xf32>
      %42 = vector.broadcast %41 : vector<32x1xf32> to vector<32x128xf32>
      %43 = arith.subf %32, %42 : vector<32x128xf32>
      %c0_27 = arith.constant 0 : index
      %c0_28 = arith.constant 0 : index
      %44 = vector.load %arg9[%c0_27, %c0_28] : memref<32x128xf32, #tpu.memory_space<vmem>>, vector<32x128xf32>
      tpu.vector_store %arg9[%c0_27, %c0_28], %43 {strides = array<i32>} : memref<32x128xf32, #tpu.memory_space<vmem>>, vector<32x128xf32>,
    } else {
    }
    return
  }
  func.func @transform_0(%arg0: i32, %arg1: i32) -> (i32, i32) {
    %c0_i32 = arith.constant 0 : i32
    return %arg0, %arg1 : i32, i32
  }
  func.func @transform_1(%arg0: i32, %arg1: i32) -> (i32, i32) {
    %c0_i32 = arith.constant 0 : i32
    %c0_i32_0 = arith.constant 0 : i32
    return %arg1, %c0_i32 : i32, i32
  }
  func.func @transform_2(%arg0: i32, %arg1: i32) -> (i32, i32) {
    %c0_i32 = arith.constant 0 : i32
    %c0_i32_0 = arith.constant 0 : i32
    %c0_i32_1 = arith.constant 0 : i32
    return %c0_i32, %c0_i32_0 : i32, i32
  }
  func.func @transform_3(%arg0: i32, %arg1: i32) -> (i32, i32) {
    %c0_i32 = arith.constant 0 : i32
    %c0_i32_0 = arith.constant 0 : i32
    %c0_i32_1 = arith.constant 0 : i32
    return %c0_i32, %c0_i32_0 : i32, i32
  }
  func.func @transform_4(%arg0: i32, %arg1: i32) -> (i32, i32) {
    %c0_i32 = arith.constant 0 : i32
    %c0_i32_0 = arith.constant 0 : i32
    %c0_i32_1 = arith.constant 0 : i32
    return %c0_i32, %c0_i32_0 : i32, i32
  }
  func.func @transform_5(%arg0: i32, %arg1: i32) -> (i32, i32) {
    %c0_i32 = arith.constant 0 : i32
    %c0_i32_0 = arith.constant 0 : i32
    %c0_i32_1 = arith.constant 0 : i32
    return %c0_i32, %c0_i32_0 : i32, i32
  }
  func.func @transform_6(%arg0: i32, %arg1: i32) -> (i32, i32) {
    %c0_i32 = arith.constant 0 : i32
    %c0_i32_0 = arith.constant 0 : i32
    %c0_i32_1 = arith.constant 0 : i32
    return %c0_i32, %c0_i32_0 : i32, i32
  }
  func.func @transform_7(%arg0: i32, %arg1: i32) -> (i32, i32) {
    %c0_i32 = arith.constant 0 : i32
    %c0_i32_0 = arith.constant 0 : i32
    return %arg0, %c0_i32 : i32, i32
  }
}

</mosaic_0001>

<bundles_post_ra>
// kernel: tpu_custom_call.1
= control target key start
LH: loop header
LB: loop body
LE: loop exit
PB: predicated region body
PF: predicated region fallthrough
CT: control target
= control target key end

     0   :  { %s2477_s0 = inlined_call_operand.hbm [shape: f32[64,512], index: 0, kind: input, shape index: {}]   ;;  %s2478_s1 = inlined_call_operand.hbm [shape: bf16[512,256], index: 1, kind: input, shape index: {}]   ;;  %s2479_s2 = inlined_call_operand.hbm [shape: f32[1,256], index: 2, kind: input, shape index: {}]   ;;  %s2480_s3 = inlined_call_operand.hbm [shape: bf16[256,128], index: 3, kind: input, shape index: {}]   ;;  %s2481_s4 = inlined_call_operand.vmem [shape: f32[1,128], index: 4, kind: input, shape index: {}]   ;;  %s2482_s5 = inlined_call_operand.hbm [shape: bf16[128,128], index: 5, kind: input, shape index: {}]   ;;  %s2483_s6 = inlined_call_operand.vmem [shape: f32[1,128], index: 6, kind: input, shape index: {}]   ;;  %s2484_s7 = inlined_call_operand.hbm [shape: f32[64,128], index: 7, kind: output, shape index: {}]  }
   0x1   :  { %2494 = sst [smem:[#allocation29_spill]] %s2477_s0 }
   0x2   :  { %2495 = sst [smem:[#allocation30_spill]] %s2479_s2 }
   0x3   :  { %2496 = sst [smem:[#allocation31_spill]] %s2480_s3 }
   0x4   :  { %2497 = sst [smem:[#allocation32_spill]] %s2481_s4 }
   0x5   :  { %2498 = sst [smem:[#allocation33_spill]] %s2482_s5 }
   0x6   :  { %2499 = sst [smem:[#allocation34_spill]] %s2483_s6 }
   0x7   :  { %2500 = sst [smem:[#allocation35_spill]] %s2484_s7 }
   0x8   :  { %12 = vsyncpa [#allocation4], 0 }
   0x9   :  { %14 = vsyncpa [#allocation4 + $0x1], 0 }
   0xa   :  { %15 = vsyncpa [#allocation7], 0 }
   0xb   :  { %17 = vsyncpa [#allocation7 + $0x1], 0 }
   0xc   :  { %18 = vsyncpa [#allocation10], 0 }
   0xd   :  { %19 = vsyncpa [#allocation5], 0 }
   0xe   :  { %21 = vsyncpa [#allocation5 + $0x1], 0  ;;  %s2104_s24 = smov 0   ;;  %s2106_s25 = smov 0  }
   0xf   :  { %s2108_s26 = smov 0   ;;  %s2110_s27 = smov 0  }
  0x10   :  { %s2112_s28 = smov 0   ;;  %s2114_s29 = smov 0  }
  0x11   :  { %s2116_s30 = smov 0   ;;  %s2118_s8 = smov 0  }
  0x12   :  { %s2120_s9 = smov 0   ;;  %s2122_s10 = smov 0  }
  0x13   :  { %s2124_s11 = smov 0   ;;  %s2126_s12 = smov 0  }
  0x14   :  { %s2128_s13 = smov 0   ;;  %s2130_s14 = smov 0  }
  0x15 LB: > { %2501 = sst [smem:[#allocation18_spill]] %s1997_s24  ;;  %s2171_s15 = sadd.s32 4294967295, %s2049_s14   ;;  %s2049_s14 = sphi %s2130_s14, %s27_s14   ;;  %s2045_s13 = sphi %s2128_s13, %s2539_s13   ;;  %s2041_s12 = sphi %s2126_s12, %s2549_s12   ;;  %s2037_s11 = sphi %s2124_s11, %s2537_s11   ;;  %s2033_s10 = sphi %s2122_s10, %s2548_s10   ;;  %s2029_s9 = sphi %s2120_s9, %s2536_s9   ;;  %s2025_s8 = sphi %s2118_s8, %s2547_s8   ;;  %s2021_s30 = sphi %s2116_s30, %s2546_s30   ;;  %s2017_s29 = sphi %s2114_s29, %s2545_s29   ;;  %s2013_s28 = sphi %s2112_s28, %s2544_s28   ;;  %s2009_s27 = sphi %s2110_s27, %s2543_s27   ;;  %s2005_s26 = sphi %s2108_s26, %s2542_s26   ;;  %s2001_s25 = sphi %s2106_s25, %s2541_s25   ;;  %s1997_s24 = sphi %s2104_s24, %s2540_s24  }
  0x16   : > { %2502 = sst [smem:[#allocation19_spill]] %s2029_s9  ;;  %s1230_s16 = sadd.s32 4294967294, %s2049_s14  }
  0x17   : > { %2503 = sst [smem:[#allocation20_spill]] %s2033_s10  ;;  %p61_p0 = scmp.ne.s32.totalorder %s2025_s8, %s2021_s30 }
  0x18   : > { %2504 = sst [smem:[#allocation21_spill]] %s2037_s11  ;;  %p62_p1 = scmp.eq.s32.totalorder %s2171_s15, 0 }
  0x19   : > { %2505 = sst [smem:[#allocation22_spill]] %s2045_s13  ;;  %p87_p2 = scmp.ne.s32.totalorder %s2013_s28, %s2009_s27 }
  0x1a   : > { %p2180_p3 = por %p62_p1, %p61_p0  ;;  %p215_p4 = scmp.ne.s32.totalorder %s2005_s26, %s2001_s25 }
  0x1b   : > { %p2188_p5 = por %p87_p2, %p62_p1  ;;  %p216_p6 = scmp.eq.s32.totalorder %s2171_s15, 3 }
  0x1c   : > { %p221_p7 = scmp.ne.s32.totalorder %s2001_s25, %s1997_s24  ;;  %p222_p8 = scmp.eq.s32.totalorder %s1230_s16, 3 }
  0x1d   : > { %p2195_p9 = por %p216_p6, %p215_p4  ;;  %p1231_p10 = scmp.ge.s32.totalorder %s2049_s14, 1 }
  0x1e   : > { %p2200_p11 = por %p222_p8, %p221_p7  ;;  %p229_p12 = scmp.lt.s32.totalorder %s2049_s14, 5 }
  0x1f   : > { %s2508_s20 = scalar_select %p2195_p9, 1, 0 }
  0x20   : > { %s2510_s21 = scalar_select %p2200_p11, 1, 0 }
  0x21   : > { %2509 = sst [smem:[#allocation23_spill]] %s2508_s20  ;;  %p2208_p13 = pnand %p1231_p10, %p229_p12 }
  0x22   : > { %2511 = sst [smem:[#allocation24_spill]] %s2510_s21  ;;  %s2051_s16 = smov [#allocation8]  }
  0x23   : > { %s2512_s2 = sld [smem:[#allocation30_spill]]  ;;  %p1569_p0 = pneg %p2208_p13 }
  0x24   : > { %s243_s17 = sshll.u32 %s2051_s16, 4  ;;  %s2514_s3 = sld [smem:[#allocation31_spill]]  ;;  %s244_s17 = int_to_ptr.vmem [resolvable:$true] %s243_s17 }
  0x25   : > { %p2219_p2 = pnand %p1569_p0, %p62_p1  ;;  %s2052_s23 = smov [#allocation9]  }
  0x26   : > { %s2053_s7 = smov 64   ;;  %s2054_s24 = smov 4  }
  0x27   : > { %s2516_s5 = sld [smem:[#allocation33_spill]]  ;;  %s2055_s11 = smov [#allocation11]  }
  0x28   : > { %s48_s6 = sadd.s32 1, %s2029_s9  ;;  %p55_p6 = scmp.ne.s32.totalorder %s2029_s9, %s2025_s8 }
  0x29   : > { %s241_s27 = sshll.u32 %s2512_s2, 4  ;;  %s254_s2 = sshll.u32 %s2052_s23, 4  ;;  %s242_s27 = int_to_ptr.hbm [resolvable:$true] %s241_s27  ;;  %s255_s2 = int_to_ptr.vmem [resolvable:$true] %s254_s2 }
  0x2a   : > { %s252_s21 = sshll.u32 %s2514_s3, 4  ;;  %s271_s23 = sshll.u32 %s2055_s11, 4  ;;  %s253_s21 = int_to_ptr.hbm [resolvable:$true] %s252_s21  ;;  %s272_s23 = int_to_ptr.vmem [resolvable:$true] %s271_s23 }
  0x2b   : > { %1572 = dma.hbm_to_vmem [thread:$0]  (!%p2219_p2), %s242_s27, 32, %s244_s17, [#allocation7]  }
  0x2c   : > { %1575 = dma.hbm_to_vmem [thread:$0]  (!%p2219_p2), %s253_s21, 2048, %s255_s2, [#allocation10], %s2053_s7, %s2053_s7, %s2054_s24  }
  0x2d   : > { %s269_s20 = sshll.u32 %s2516_s5, 4  ;;  %s36_s17 = sadd.s32 1, %s2041_s12  ;;  %s270_s20 = int_to_ptr.hbm [resolvable:$true] %s269_s20 }
  0x2e   : > { %1578 = dma.hbm_to_vmem [thread:$0]  (!%p2219_p2), %s270_s20, 1024, %s272_s23, [#allocation10], %s2053_s7, %s2053_s7, %s2054_s24  }
  0x2f   : > { %p37_p4 = scmp.ge.s32.totalorder %s36_s17, 2  ;;  %s39_s27 = sadd.s32 1, %s2045_s13 }
  0x30   : > { %p56_p7 = scmp.eq.s32.totalorder %s2049_s14, 0  ;;  %p1593_p0 = scmp.lt.s32.totalorder %s2049_s14, 4 }
  0x31   : > { %s2551_s17 = smov (%p37_p4, %s36_s17), 0  ;;  %s2553_s27 = smov (!%p37_p4, %s39_s27), %s2045_s13 }
  0x32   : > { %2517 = sst [smem:[#allocation25_spill]] %s2551_s17  ;;  %s2242_s2 = ssub.s32 %s2041_s12, %s2551_s17 }
  0x33   : > { %p41_p8 = scmp.ge.s32.totalorder %s2553_s27, 2  ;;  %p72_p10 = scmp.eq.s32.totalorder %s2242_s2, 0 }
  0x34   : > { %p2248_p12 = por %p56_p7, %p55_p6  ;;  %s288_s11 = sand.u32 1, %s2029_s9  }
  0x35   : > { %s2555_s27 = smov (%p41_p8, %s2553_s27), 0  ;;  %s1238_s20 = sshll.u32 %s2041_s12, 1 }
  0x36   : > { %2519 = sst [smem:[#allocation26_spill]] %s2555_s27  ;;  %s43_s21 = ssub.s32 %s2045_s13, %s2555_s27 }
  0x37   : > { %s45_s22 = sor.u32 %s2242_s2, %s43_s21  ;;  %p203_p2 = scmp.eq.s32.totalorder %s43_s21, 0 }
  0x38   : > { %p46_p4 = scmp.eq.s32.totalorder %s45_s22, 0  ;;  %s1236_s7 = sshll.u32 %s288_s11, 6 }
  0x39   : > { %s2520_s24 = sadd.s32 1, %s2005_s26  ;;  %s1483_s5 = sshll.u32 %s2045_s13, 4 }
  0x3a   : > { %s2263_s16 = scalar_select %p203_p2, %s2005_s26, %s2520_s24  }
  0x3b   : > { %s2266_s23 = scalar_select %p46_p4, %s2029_s9, %s48_s6  }
  0x3c   : > { %2521 = sst [smem:[#allocation27_spill]] %s2263_s16  ;;  %s298_s17 = sadd.s32 %s1483_s5, %s1238_s20 }
  0x3d   : > { %2522 = sst [smem:[#allocation28_spill]] %s2266_s23  ;;  %s292_s4 = scalar_lea.vmem [#allocation3], %s1236_s7 }
  0x3e   : > { %s303_s10 = sshll.u32 %s292_s4, 4  ;;  %s1240_s27 = sshll.u32 %s298_s17, 3  ;;  %s304_s10 = int_to_ptr.vmem [resolvable:$true] %s303_s10 }
  0x3f   : > { %s2523_s0 = sld [smem:[#allocation29_spill]]  ;;  %p1580_p6 = pnand %p1593_p0, %p2248_p12 }
  0x40   : > { %s289_s5 = scalar_lea.sflag [#allocation4], %s288_s11  ;;  %s2056_s20 = smov 512  }
  0x41   : > { %s2057_s7 = smov 256   ;;  %s2058_s13 = smov 16  }
  0x42   : > { %s313_s4 = sand.u32 1, %s2049_s14   ;;  %s74_s17 = sadd.s32 1, %s2017_s29 }
  0x43   : > { %p81_p8 = scmp.ne.s32.totalorder %s2017_s29, %s2013_s28  ;;  %s1485_s21 = sshll.u32 %s2041_s12, 8 }
  0x44   : > { %s2283_s23 = scalar_select %p72_p10, %s2017_s29, %s74_s17  }
  0x45   : > { %s300_s24 = scalar_lea.hbm %s2523_s0, %s1240_s27  ;;  %p83_p2 = por %p81_p8, %p56_p7 }
  0x46   : > { %s301_s6 = sshll.u32 %s300_s24, 4  ;;  %s315_s27 = sand.u32 1, %s2017_s29   ;;  %s302_s6 = int_to_ptr.hbm [resolvable:$true] %s301_s6 }
  0x47   : > { %1582 = dma.hbm_to_vmem [thread:$0]  (!%p1580_p6), %s302_s6, 1024, %s304_s10, %s289_s5, %s2056_s20, %s2057_s7, %s2058_s13  }
  0x48   : > { %s1241_s3 = sshll.u32 %s315_s27, 8  ;;  %s323_s11 = scalar_lea.hbm %s2478_s1, %s1485_s21 }
  0x49   : > { %s324_s0 = sshll.u32 %s323_s11, 4  ;;  %s317_s9 = scalar_lea.vmem [#allocation6], %s1241_s3  ;;  %s325_s0 = int_to_ptr.hbm [resolvable:$true] %s324_s0 }
  0x4a   : > { %s326_s16 = sshll.u32 %s317_s9, 4  ;;  %p1583_p12 = pnand %p1593_p0, %p83_p2  ;;  %s327_s16 = int_to_ptr.vmem [resolvable:$true] %s326_s16 }
  0x4b   : > { %s314_s10 = scalar_lea.sflag [#allocation7], %s313_s4  ;;  %s2059_s13 = smov 128  }
  0x4c   : > { %s2060_s2 = smov 8   ;;  %338 = sbr.rel (%p2208_p13) target bundleno = 920 (0x398), region = 48 }
  0x4d   : > { %1585 = dma.hbm_to_vmem [thread:$0]  (!%p1583_p12), %s325_s0, 4096, %s327_s16, %s314_s10, %s2059_s13, %s2059_s13, %s2060_s2  }
  0x4e   : > { %s340_s6 = sand.u32 (!%p2208_p13), 1, %s2025_s8  }
  0x4f   : > { %s1246_s5 = sshll.u32 (!%p2208_p13), %s340_s6, 6  ;;  %s341_s20 = scalar_lea.sflag (!%p2208_p13), [#allocation4], %s340_s6 }
  0x50   : > { %s2297_s7 = scalar_lea.vmem (!%p2208_p13), [#allocation3], %s1246_s5 }
  0x51   : > { %1976 = dma.done.wait (%p2180_p3), %s341_s20, 1024  }
  0x52   : > { %1978 = vsyncadd (%p2180_p3), %s341_s20, 4294966272  ;;  %s350_s9 = sand.u32 1, %s2171_s15   ;;  %s352_s0 = sand.u32 1, %s2013_s28  }
  0x53   : > { %s1247_s16 = sshll.u32 %s352_s0, 8  ;;  %s351_s30 = scalar_lea.sflag [#allocation7], %s350_s9 }
  0x54   : > { %s2305_s4 = scalar_lea.vmem [#allocation6], %s1247_s16 }
  0x55   : > { %1980 = dma.done.wait (%p2188_p5), %s351_s30, 4096  }
  0x56   : > { %1982 = vsyncadd (%p2188_p5), %s351_s30, 4294963200 }
  0x57   : > { %1984 = dma.done.wait (%p62_p1), [#allocation7], 32  }
  0x58   : > { %1986 = vsyncadd (%p62_p1), [#allocation7], 4294967264 }
  0x59   : > { %1988 = dma.done.wait (%p62_p1), [#allocation10], 3072  }
  0x5a   : > { %1990 = vsyncadd (%p62_p1), [#allocation10], 4294964224  ;;  %s403_s18 = sand.u32 1, %s2001_s25   ;;  %s2524_s19 = sld [smem:[#allocation20_spill]] }
  0x5b   : > { %s1251_s17 = sshll.u32 %s403_s18, 5 }
  0x5c   : > { %s2322_s27 = scalar_lea.vmem [#allocation12], %s1251_s17 }
  0x60   : > { %p1252_p3 = scmp.ne.s32.totalorder %s2524_s19, 0 }
  0x62   : > { %413 = sbr.rel (%p1252_p3) target bundleno = 112 (0x70), region = 72 }
  0x67   : > { %v2061_v0 = vmov 0.0  }
  0x68   : > { %414 = vst [vmem:[#allocation2 + $0x30] sm:$0xff] %v2061_v0 }
  0x69   : > { %415 = vst [vmem:[#allocation2] sm:$0xff] %v2061_v0 }
  0x6a   : > { %416 = vst [vmem:[#allocation2 + $0x18] sm:$0xff] %v2061_v0 }
  0x6b   : > { %417 = vst [vmem:[#allocation2 + $0x10] sm:$0xff] %v2061_v0 }
  0x6c   : > { %418 = vst [vmem:[#allocation2 + $0x8] sm:$0xff] %v2061_v0 }
  0x6d   : > { %419 = vst [vmem:[#allocation2 + $0x20] sm:$0xff] %v2061_v0 }
  0x6e   : > { %420 = vst [vmem:[#allocation2 + $0x28] sm:$0xff] %v2061_v0 }
  0x6f   : > { %421 = vst [vmem:[#allocation2 + $0x38] sm:$0xff] %v2061_v0 }
  0x70 PF: > { %v1311_v1 = vld [vmem:[%s2305_s4 + $0x70] sm:$0xf]  ;;  %v1501_v2 = vld [vmem:[%s2305_s4 + $0x74] sm:$0xf0]  ;;  %v1500_v6 = vld [vmem:[%s2305_s4 + $0x74] sm:$0xf] }
  0x71   : > { %v1375_v3 = vld [vmem:[%s2305_s4 + $0xf0] sm:$0xf]  ;;  %v1312_v4 = vor.u32 %v1501_v2, %v1311_v1  ;;  %v1517_v5 = vld [vmem:[%s2305_s4 + $0xf4] sm:$0xf0]  ;;  %v1313_v7 = vld [vmem:[%s2305_s4 + $0x78] sm:$0xf0] }
  0x72   : > { %v1376_v8 = vor.u32 %v1517_v5, %v1375_v3  ;;  %v1316_v9 = vor.u32 %v1500_v6, %v1313_v7  ;;  %v1516_v10 = vld [vmem:[%s2305_s4 + $0xf4] sm:$0xf]  ;;  %v1377_v11 = vld [vmem:[%s2305_s4 + $0xf8] sm:$0xf0]  ;;  %v1303_v12 = vld [vmem:[%s2305_s4 + $0x60] sm:$0xf] }
  0x73   : > { %634 = vmatpush.bf16.msra.mxu0 %v1312_v4  ;;  %v1380_v13 = vor.u32 %v1516_v10, %v1377_v11  ;;  %v1499_v14 = vld [vmem:[%s2305_s4 + $0x64] sm:$0xf0]  ;;  %v1367_v15 = vld [vmem:[%s2305_s4 + $0xe0] sm:$0xf]  ;;  %v1498_v19 = vld [vmem:[%s2305_s4 + $0x64] sm:$0xf] }
  0x74   : > { %v1515_v16 = vld [vmem:[%s2305_s4 + $0xe4] sm:$0xf0]  ;;  %653 = vmatpush.bf16.msra.mxu1 %v1376_v8  ;;  %672 = vmatpush.bf16.msra.mxu2 %v1316_v9  ;;  %v1304_v17 = vor.u32 %v1499_v14, %v1303_v12  ;;  %v1305_v20 = vld [vmem:[%s2305_s4 + $0x68] sm:$0xf0]  ;;  %v1514_v21 = vld [vmem:[%s2305_s4 + $0xe4] sm:$0xf] }
  0x75   : > { %v1368_v18 = vor.u32 %v1515_v16, %v1367_v15  ;;  %691 = vmatpush.bf16.msra.mxu3 %v1380_v13  ;;  %v1308_v22 = vor.u32 %v1498_v19, %v1305_v20  ;;  %v1369_v23 = vld [vmem:[%s2305_s4 + $0xe8] sm:$0xf0]  ;;  %v1295_v24 = vld [vmem:[%s2305_s4 + $0x50] sm:$0xf]  ;;  %v1497_v25 = vld [vmem:[%s2305_s4 + $0x54] sm:$0xf0] }
  0x76   : > { %v1372_v26 = vor.u32 %v1514_v21, %v1369_v23  ;;  %v1359_v27 = vld [vmem:[%s2305_s4 + $0xd0] sm:$0xf]  ;;  %v1513_v28 = vld [vmem:[%s2305_s4 + $0xd4] sm:$0xf0]  ;;  %v1496_v29 = vld [vmem:[%s2305_s4 + $0x54] sm:$0xf]  ;;  %v1296_v30 = vor.u32 %v1497_v25, %v1295_v24 }
  0x77   : > { %635 = vmatpush.bf16.msra.mxu0 %v1304_v17  ;;  %v1297_v31 = vld [vmem:[%s2305_s4 + $0x58] sm:$0xf0]  ;;  %v1512_v32 = vld [vmem:[%s2305_s4 + $0xd4] sm:$0xf]  ;;  %v1360_v34 = vor.u32 %v1513_v28, %v1359_v27  ;;  %v1287_v36 = vld [vmem:[%s2305_s4 + $0x40] sm:$0xf] }
  0x78   : > { %v1361_v33 = vld [vmem:[%s2305_s4 + $0xd8] sm:$0xf0]  ;;  %654 = vmatpush.bf16.msra.mxu1 %v1368_v18  ;;  %673 = vmatpush.bf16.msra.mxu2 %v1308_v22  ;;  %v1300_v35 = vor.u32 %v1496_v29, %v1297_v31  ;;  %v1495_v37 = vld [vmem:[%s2305_s4 + $0x44] sm:$0xf0]  ;;  %v1351_v38 = vld [vmem:[%s2305_s4 + $0xc0] sm:$0xf] }
  0x79   : > { %692 = vmatpush.bf16.msra.mxu3 %v1372_v26  ;;  %v1364_v39 = vor.u32 %v1512_v32, %v1361_v33  ;;  %v1511_v40 = vld [vmem:[%s2305_s4 + $0xc4] sm:$0xf0]  ;;  %v1494_v41 = vld [vmem:[%s2305_s4 + $0x44] sm:$0xf]  ;;  %v1289_v42 = vld [vmem:[%s2305_s4 + $0x48] sm:$0xf0]  ;;  %v1288_v45 = vor.u32 %v1495_v37, %v1287_v36 }
  0x7a   : > { %v1510_v43 = vld [vmem:[%s2305_s4 + $0xc4] sm:$0xf]  ;;  %v1353_v44 = vld [vmem:[%s2305_s4 + $0xc8] sm:$0xf0]  ;;  %v1352_v46 = vor.u32 %v1511_v40, %v1351_v38  ;;  %v1292_v47 = vor.u32 %v1494_v41, %v1289_v42  ;;  %v1279_v48 = vld [vmem:[%s2305_s4 + $0x30] sm:$0xf] }
  0x7b   : > { %636 = vmatpush.bf16.msra.mxu0 %v1296_v30  ;;  %v1493_v49 = vld [vmem:[%s2305_s4 + $0x34] sm:$0xf0]  ;;  %v1343_v50 = vld [vmem:[%s2305_s4 + $0xb0] sm:$0xf]  ;;  %v1356_v51 = vor.u32 %v1510_v43, %v1353_v44  ;;  %v1492_v53 = vld [vmem:[%s2305_s4 + $0x34] sm:$0xf] }
  0x7c   : > { %655 = vmatpush.bf16.msra.mxu1 %v1360_v34  ;;  %674 = vmatpush.bf16.msra.mxu2 %v1300_v35  ;;  %v1509_v52 = vld [vmem:[%s2305_s4 + $0xb4] sm:$0xf0]  ;;  %v1281_v54 = vld [vmem:[%s2305_s4 + $0x38] sm:$0xf0]  ;;  %v1508_v55 = vld [vmem:[%s2305_s4 + $0xb4] sm:$0xf]  ;;  %v1280_v57 = vor.u32 %v1493_v49, %v1279_v48 }
  0x7d   : > { %693 = vmatpush.bf16.msra.mxu3 %v1364_v39  ;;  %v1345_v56 = vld [vmem:[%s2305_s4 + $0xb8] sm:$0xf0]  ;;  %v1344_v58 = vor.u32 %v1509_v52, %v1343_v50  ;;  %v1284_v59 = vor.u32 %v1492_v53, %v1281_v54  ;;  %v1271_v60 = vld [vmem:[%s2305_s4 + $0x20] sm:$0xf]  ;;  %v1491_v61 = vld [vmem:[%s2305_s4 + $0x24] sm:$0xf0] }
  0x7e   : > { %v1335_v62 = vld [vmem:[%s2305_s4 + $0xa0] sm:$0xf]  ;;  %v1348_v63 = vor.u32 %v1508_v55, %v1345_v56  ;;  %v1507_v0 = vld [vmem:[%s2305_s4 + $0xa4] sm:$0xf0]  ;;  %v1490_v1 = vld [vmem:[%s2305_s4 + $0x24] sm:$0xf]  ;;  %v1272_v5 = vor.u32 %v1491_v61, %v1271_v60 }
  0x7f   : > { %637 = vmatpush.bf16.msra.mxu0 %v1288_v45  ;;  %v1273_v2 = vld [vmem:[%s2305_s4 + $0x28] sm:$0xf0]  ;;  %v1506_v3 = vld [vmem:[%s2305_s4 + $0xa4] sm:$0xf]  ;;  %v1336_v6 = vor.u32 %v1507_v0, %v1335_v62  ;;  %v1263_v8 = vld [vmem:[%s2305_s4 + $0x10] sm:$0xf] }
  0x80   : > { %656 = vmatpush.bf16.msra.mxu1 %v1352_v46  ;;  %675 = vmatpush.bf16.msra.mxu2 %v1292_v47  ;;  %v1337_v4 = vld [vmem:[%s2305_s4 + $0xa8] sm:$0xf0]  ;;  %v1276_v7 = vor.u32 %v1490_v1, %v1273_v2  ;;  %v1489_v9 = vld [vmem:[%s2305_s4 + $0x14] sm:$0xf0]  ;;  %v1327_v10 = vld [vmem:[%s2305_s4 + $0x90] sm:$0xf] }
  0x81   : > { %694 = vmatpush.bf16.msra.mxu3 %v1356_v51  ;;  %v1340_v11 = vor.u32 %v1506_v3, %v1337_v4  ;;  %v1505_v12 = vld [vmem:[%s2305_s4 + $0x94] sm:$0xf0]  ;;  %v1488_v13 = vld [vmem:[%s2305_s4 + $0x14] sm:$0xf]  ;;  %v1265_v14 = vld [vmem:[%s2305_s4 + $0x18] sm:$0xf0]  ;;  %v1264_v17 = vor.u32 %v1489_v9, %v1263_v8 }
  0x82   : > { %v1504_v15 = vld [vmem:[%s2305_s4 + $0x94] sm:$0xf]  ;;  %v1329_v16 = vld [vmem:[%s2305_s4 + $0x98] sm:$0xf0]  ;;  %v1328_v18 = vor.u32 %v1505_v12, %v1327_v10  ;;  %v1268_v19 = vor.u32 %v1488_v13, %v1265_v14  ;;  %v1255_v20 = vld [vmem:[%s2305_s4] sm:$0xf] }
  0x83   : > { %638 = vmatpush.bf16.msra.mxu0 %v1280_v57  ;;  %v1487_v21 = vld [vmem:[%s2305_s4 + $0x4] sm:$0xf0]  ;;  %v1319_v22 = vld [vmem:[%s2305_s4 + $0x80] sm:$0xf]  ;;  %v1332_v23 = vor.u32 %v1504_v15, %v1329_v16  ;;  %v1486_v25 = vld [vmem:[%s2305_s4 + $0x4] sm:$0xf] }
  0x84   : > { %657 = vmatpush.bf16.msra.mxu1 %v1344_v58  ;;  %676 = vmatpush.bf16.msra.mxu2 %v1284_v59  ;;  %v1503_v24 = vld [vmem:[%s2305_s4 + $0x84] sm:$0xf0]  ;;  %v1257_v26 = vld [vmem:[%s2305_s4 + $0x8] sm:$0xf0]  ;;  %v1502_v27 = vld [vmem:[%s2305_s4 + $0x84] sm:$0xf]  ;;  %v1256_v29 = vor.u32 %v1487_v21, %v1255_v20 }
  0x85   : > { %695 = vmatpush.bf16.msra.mxu3 %v1348_v63  ;;  %v1321_v28 = vld [vmem:[%s2305_s4 + $0x88] sm:$0xf0]  ;;  %v430_v30 = vld [vmem:[%s2297_s7] sm:$0xff]  ;;  %v432_v31 = vld [vmem:[%s2297_s7 + $0x10] sm:$0xff]  ;;  %v1320_v32 = vor.u32 %v1503_v24, %v1319_v22  ;;  %v1260_v33 = vor.u32 %v1486_v25, %v1257_v26  ;;  %s2525_s15 = sld [smem:[#allocation20_spill]] }
  0x86   : > { %v431_v34 = vld [vmem:[%s2297_s7 + $0x8] sm:$0xff]  ;;  %v433_v35 = vld [vmem:[%s2297_s7 + $0x18] sm:$0xff]  ;;  %v1324_v36 = vor.u32 %v1502_v27, %v1321_v28  ;;  %v438_v37 = vpack.c.bf16 %v432_v31, %v430_v30  ;;  %v434_v39 = vld [vmem:[%s2297_s7 + $0x20] sm:$0xff] }
  0x87   : > { %639 = vmatpush.bf16.msra.mxu0 %v1272_v5  ;;  %v439_v38 = vpack.c.bf16 %v433_v35, %v431_v34  ;;  %v436_v40 = vld [vmem:[%s2297_s7 + $0x30] sm:$0xff]  ;;  %v435_v41 = vld [vmem:[%s2297_s7 + $0x28] sm:$0xff]  ;;  %v437_v42 = vld [vmem:[%s2297_s7 + $0x38] sm:$0xff] }
  0x88   : > { %658 = vmatpush.bf16.msra.mxu1 %v1336_v6  ;;  %677 = vmatpush.bf16.msra.mxu2 %v1276_v7  ;;  %v440_v43 = vpack.c.bf16 %v436_v40, %v434_v39  ;;  %v441_v44 = vpack.c.bf16 %v437_v42, %v435_v41  ;;  %v422_v46 = vld [vmem:[#allocation2 + $0x30] sm:$0xff]  ;;  %v423_v51 = vld [vmem:[#allocation2] sm:$0xff]  ;;  %v424_v55 = vld [vmem:[#allocation2 + $0x18] sm:$0xff] }
  0x89   : > { %696 = vmatpush.bf16.msra.mxu3 %v1340_v11  ;;  %v425_v61 = vld [vmem:[#allocation2 + $0x10] sm:$0xff]  ;;  %v426_v1 = vld [vmem:[#allocation2 + $0x8] sm:$0xff]  ;;  %v427_v7 = vld [vmem:[#allocation2 + $0x20] sm:$0xff] }
  0x8a   : > { %v428_v11 = vld [vmem:[#allocation2 + $0x28] sm:$0xff] }
  0x8b   : > { %640 = vmatpush.bf16.msra.mxu0 %v1264_v17  ;;  %v429_v17 = vld [vmem:[#allocation2 + $0x38] sm:$0xff]  ;;  %p1381_p1 = scmp.ne.s32.totalorder %s2525_s15, 1 }
  0x8c   : > { %659 = vmatpush.bf16.msra.mxu1 %v1328_v18  ;;  %678 = vmatpush.bf16.msra.mxu2 %v1268_v19  ;;  %s2526_s22 = sld [smem:[#allocation32_spill]] (!%p1381_p1) }
  0x8d   : > { %697 = vmatpush.bf16.msra.mxu3 %v1332_v23  ;;  %s2527_s10 = sld [smem:[#allocation34_spill]] (!%p1381_p1) }
  0x8f   : > { %641 = vmatpush.bf16.msra.mxu0 %v1256_v29 }
  0x90   : > { %660 = vmatpush.bf16.msra.mxu1 %v1320_v32  ;;  %679 = vmatpush.bf16.msra.mxu2 %v1260_v33 }
  0x91   : > { %698 = vmatpush.bf16.msra.mxu3 %v1324_v36 }
  0x92   : > { %642 = vmatmul.bf16.vlgmr.msra.gmra.mxu0 %v438_v37 }
  0x93   : > { %661 = vmatmul.bf16.vlgmr.msra.gmra.mxu1 %v439_v38  ;;  %680 = vmatmul.bf16.vlgmr.msra.gmra.mxu2 %v438_v37 }
  0x94   : > { %699 = vmatmul.bf16.vlgmr.msra.gmra.mxu3 %v439_v38 }
  0xa2   : > { %647 = vmatmul.bf16.gmra.mxu0 %v440_v43 }
  0xa3   : > { %666 = vmatmul.bf16.gmra.mxu1 %v441_v44  ;;  %685 = vmatmul.bf16.gmra.mxu2 %v440_v43 }
  0xa4   : > { %704 = vmatmul.bf16.gmra.mxu3 %v441_v44 }
 0x10f   : > { %v643_v45 = vpop.f32.mrf.mxu0 }
 0x110   : > { %v662_v47 = vpop.f32.mrf.mxu1 }
 0x111   : > { %v663_v48 = vadd.f32 %v662_v47, %v643_v45 }
 0x113   : > { %v710_v49 = vadd.f32 %v663_v48, %v422_v46 }
 0x115   : > { %718 = vst [vmem:[#allocation2 + $0x30] sm:$0xff] %v710_v49 }
 0x116   : > { %v681_v50 = vpop.f32.mrf.mxu2 }
 0x117   : > { %v700_v52 = vpop.f32.mrf.mxu3  ;;  %v645_v53 = vpop.f32.mrf.mxu0 }
 0x118   : > { %v701_v54 = vadd.f32 %v700_v52, %v681_v50  ;;  %v664_v56 = vpop.f32.mrf.mxu1 }
 0x119   : > { %v665_v57 = vadd.f32 %v664_v56, %v645_v53 }
 0x11a   : > { %v711_v58 = vadd.f32 %v701_v54, %v423_v51 }
 0x11b   : > { %v712_v59 = vadd.f32 %v665_v57, %v424_v55 }
 0x11c   : > { %719 = vst [vmem:[#allocation2] sm:$0xff] %v711_v58 }
 0x11d   : > { %720 = vst [vmem:[#allocation2 + $0x18] sm:$0xff] %v712_v59 }
 0x11e   : > { %v683_v60 = vpop.f32.mrf.mxu2 }
 0x11f   : > { %v702_v62 = vpop.f32.mrf.mxu3  ;;  %v648_v63 = vpop.f32.mrf.mxu0 }
 0x120   : > { %v703_v0 = vadd.f32 %v702_v62, %v683_v60  ;;  %v667_v2 = vpop.f32.mrf.mxu1 }
 0x121   : > { %v668_v3 = vadd.f32 %v667_v2, %v648_v63 }
 0x122   : > { %v713_v4 = vadd.f32 %v703_v0, %v425_v61 }
 0x123   : > { %v714_v5 = vadd.f32 %v668_v3, %v426_v1 }
 0x124   : > { %721 = vst [vmem:[#allocation2 + $0x10] sm:$0xff] %v713_v4 }
 0x125   : > { %722 = vst [vmem:[#allocation2 + $0x8] sm:$0xff] %v714_v5 }
 0x126   : > { %v686_v6 = vpop.f32.mrf.mxu2 }
 0x127   : > { %v705_v8 = vpop.f32.mrf.mxu3  ;;  %v650_v9 = vpop.f32.mrf.mxu0 }
 0x128   : > { %v706_v10 = vadd.f32 %v705_v8, %v686_v6  ;;  %v669_v12 = vpop.f32.mrf.mxu1 }
 0x129   : > { %v670_v13 = vadd.f32 %v669_v12, %v650_v9 }
 0x12a   : > { %v715_v14 = vadd.f32 %v706_v10, %v427_v7 }
 0x12b   : > { %v716_v15 = vadd.f32 %v670_v13, %v428_v11 }
 0x12c   : > { %723 = vst [vmem:[#allocation2 + $0x20] sm:$0xff] %v715_v14 }
 0x12d   : > { %724 = vst [vmem:[#allocation2 + $0x28] sm:$0xff] %v716_v15 }
 0x12e   : > { %v688_v16 = vpop.f32.mrf.mxu2 }
 0x12f   : > { %v707_v18 = vpop.f32.mrf.mxu3 }
 0x130   : > { %v708_v19 = vadd.f32 %v707_v18, %v688_v16  ;;  %729 = sbr.rel (%p1381_p1) target bundleno = 898 (0x382), region = 76 }
 0x132   : > { %v717_v20 = vadd.f32 %v708_v19, %v429_v17 }
 0x134   : > { %725 = vst [vmem:[#allocation2 + $0x38] sm:$0xff] %v717_v20 }
 0x135   : > { %v1525_v21 = vld [vmem:[#allocation9 + $0x38] sm:$0xff]  ;;  %v1524_v23 = vld [vmem:[#allocation9 + $0x30] sm:$0xff]  ;;  %v1523_v25 = vld [vmem:[#allocation9 + $0x28] sm:$0xff] }
 0x136   : > { %v1533_v22 = vld [vmem:[#allocation9 + $0x78] sm:$0xff]  ;;  %896 = vmatpush.bf16.msra.mxu0 %v1525_v21  ;;  %v1532_v24 = vld [vmem:[#allocation9 + $0x70] sm:$0xff]  ;;  %1543 = vmatpush.bf16.msra.mxu3 %v1525_v21  ;;  %v1531_v26 = vld [vmem:[#allocation9 + $0x68] sm:$0xff] }
 0x137   : > { %915 = vmatpush.bf16.msra.mxu1 %v1533_v22  ;;  %v1522_v27 = vld [vmem:[#allocation9 + $0x20] sm:$0xff]  ;;  %v1521_v29 = vld [vmem:[#allocation9 + $0x18] sm:$0xff]  ;;  %v1520_v32 = vld [vmem:[#allocation9 + $0x10] sm:$0xff] }
 0x138   : > { %v1530_v28 = vld [vmem:[#allocation9 + $0x60] sm:$0xff]  ;;  %v1529_v30 = vld [vmem:[#allocation9 + $0x58] sm:$0xff]  ;;  %v1528_v33 = vld [vmem:[#allocation9 + $0x50] sm:$0xff] }
 0x139   : > { %v738_v31 = vld [vmem:[#allocation8] sm:$0x3]  ;;  %v730_v34 = vld [vmem:[#allocation2 + $0x30] sm:$0xff]  ;;  %v732_v38 = vld [vmem:[#allocation2 + $0x18] sm:$0xff] }
 0x13a   : > { %897 = vmatpush.bf16.msra.mxu0 %v1524_v23  ;;  %1544 = vmatpush.bf16.msra.mxu3 %v1524_v23  ;;  %v740_v35 = vperm.slane %v738_v31, 0  ;;  %v741_v36 = vperm.slane %v738_v31, 1  ;;  %v1541_v37 = vld [vmem:[#allocation11 + $0x38] sm:$0xff]  ;;  %v733_v40 = vld [vmem:[#allocation2 + $0x10] sm:$0xff]  ;;  %v734_v41 = vld [vmem:[#allocation2 + $0x8] sm:$0xff] }
 0x13b   : > { %916 = vmatpush.bf16.msra.mxu1 %v1532_v24  ;;  %v731_v39 = vld [vmem:[#allocation2] sm:$0xff]  ;;  %v736_v42 = vld [vmem:[#allocation2 + $0x28] sm:$0xff]  ;;  %1008 = vmatpush.bf16.msra.mxu2 %v1541_v37  ;;  %v1540_v43 = vld [vmem:[#allocation11 + $0x30] sm:$0xff] }
 0x13c   : > { %v744_v44 = vadd.f32 %v740_v35, %v730_v34  ;;  %v746_v45 = vadd.f32 %v740_v35, %v732_v38  ;;  %v745_v46 = vadd.f32 %v741_v36, %v731_v39  ;;  %v747_v47 = vadd.f32 %v741_v36, %v733_v40  ;;  %v1519_v48 = vld [vmem:[#allocation9 + $0x8] sm:$0xff]  ;;  %v1518_v57 = vld [vmem:[#allocation9] sm:$0xff]  ;;  %v737_v2 = vld [vmem:[#allocation2 + $0x38] sm:$0xff] }
 0x13d   : > { %v1527_v49 = vld [vmem:[#allocation9 + $0x48] sm:$0xff]  ;;  %v748_v50 = vadd.f32 %v740_v35, %v734_v41  ;;  %v750_v51 = vadd.f32 %v740_v35, %v736_v42  ;;  %v1526_v58 = vld [vmem:[#allocation9 + $0x40] sm:$0xff]  ;;  %v751_v4 = vadd.f32 %v741_v36, %v737_v2  ;;  %v1537_v8 = vld [vmem:[#allocation11 + $0x18] sm:$0xff] }
 0x13e   : > { %898 = vmatpush.bf16.msra.mxu0 %v1523_v25  ;;  %1545 = vmatpush.bf16.msra.mxu3 %v1523_v25  ;;  %v1539_v52 = vld [vmem:[#allocation11 + $0x28] sm:$0xff]  ;;  %v752_v53 = vmax.f32 %v744_v44, 0.0  ;;  %v754_v54 = vmax.f32 %v746_v45, 0.0  ;;  %v753_v55 = vmax.f32 %v745_v46, 0.0  ;;  %v755_v56 = vmax.f32 %v747_v47, 0.0  ;;  %v1538_v61 = vld [vmem:[#allocation11 + $0x20] sm:$0xff] }
 0x13f   : > { %917 = vmatpush.bf16.msra.mxu1 %v1531_v26  ;;  %1009 = vmatpush.bf16.msra.mxu2 %v1540_v43  ;;  %v756_v59 = vmax.f32 %v748_v50, 0.0  ;;  %v758_v60 = vmax.f32 %v750_v51, 0.0  ;;  %v735_v1 = vld [vmem:[#allocation2 + $0x20] sm:$0xff]  ;;  %v759_v6 = vmax.f32 %v751_v4, 0.0  ;;  %v1536_v9 = vld [vmem:[#allocation11 + $0x10] sm:$0xff]  ;;  %v1535_v10 = vld [vmem:[#allocation11 + $0x8] sm:$0xff] }
 0x140   : > { %v760_v62 = vpack.c.bf16 %v754_v54, %v752_v53  ;;  %v761_v63 = vpack.c.bf16 %v755_v56, %v753_v55  ;;  %v749_v3 = vadd.f32 %v741_v36, %v735_v1  ;;  %v1534_v11 = vld [vmem:[#allocation11] sm:$0xff]  ;;  %v1723_v14 = vld [vmem:[%s2526_s22] ss:$0 sm:$0xff] }
 0x141   : > { %v762_v0 = vpack.c.bf16 %v758_v60, %v756_v59  ;;  %v1724_v35 = vld [vmem:[%s2527_s10] ss:$0 sm:$0xff] }
 0x142   : > { %899 = vmatpush.bf16.msra.mxu0 %v1522_v27  ;;  %1546 = vmatpush.bf16.msra.mxu3 %v1522_v27  ;;  %v757_v5 = vmax.f32 %v749_v3, 0.0 }
 0x143   : > { %918 = vmatpush.bf16.msra.mxu1 %v1530_v28  ;;  %1010 = vmatpush.bf16.msra.mxu2 %v1539_v52 }
 0x144   : > { %v763_v7 = vpack.c.bf16 %v759_v6, %v757_v5 }
 0x146   : > { %900 = vmatpush.bf16.msra.mxu0 %v1521_v29  ;;  %1547 = vmatpush.bf16.msra.mxu3 %v1521_v29 }
 0x147   : > { %919 = vmatpush.bf16.msra.mxu1 %v1529_v30  ;;  %1011 = vmatpush.bf16.msra.mxu2 %v1538_v61 }
 0x14a   : > { %901 = vmatpush.bf16.msra.mxu0 %v1520_v32  ;;  %1548 = vmatpush.bf16.msra.mxu3 %v1520_v32 }
 0x14b   : > { %920 = vmatpush.bf16.msra.mxu1 %v1528_v33  ;;  %1012 = vmatpush.bf16.msra.mxu2 %v1537_v8 }
 0x14e   : > { %902 = vmatpush.bf16.msra.mxu0 %v1519_v48  ;;  %1549 = vmatpush.bf16.msra.mxu3 %v1519_v48 }
 0x14f   : > { %921 = vmatpush.bf16.msra.mxu1 %v1527_v49  ;;  %1013 = vmatpush.bf16.msra.mxu2 %v1536_v9 }
 0x152   : > { %903 = vmatpush.bf16.msra.mxu0 %v1518_v57  ;;  %1550 = vmatpush.bf16.msra.mxu3 %v1518_v57 }
 0x153   : > { %922 = vmatpush.bf16.msra.mxu1 %v1526_v58  ;;  %1014 = vmatpush.bf16.msra.mxu2 %v1535_v10 }
 0x155   : > { %904 = vmatmul.bf16.vlgmr.msra.gmra.mxu0 %v760_v62  ;;  %909 = vmatmul.bf16.vlgmr.msra.gmra.mxu3 %v762_v0 }
 0x156   : > { %923 = vmatmul.bf16.vlgmr.msra.gmra.mxu1 %v761_v63 }
 0x157   : > { %1015 = vmatpush.bf16.msra.mxu2 %v1534_v11 }
 0x166   : > { %928 = vmatmul.bf16.gmra.mxu1 %v763_v7 }
 0x1d2   : > { %v905_v12 = vpop.f32.mrf.mxu0 }
 0x1d3   : > { %v924_v13 = vpop.f32.mrf.mxu1  ;;  %v906_v15 = vadd.f32 %v1723_v14, %v905_v12 }
 0x1d5   : > { %v925_v18 = vadd.f32 %v924_v13, %v906_v15 }
 0x1d7   : > { %v934_v22 = vmax.f32 %v925_v18, 0.0 }
 0x1d8   : > { %v910_v20 = vpop.f32.mrf.mxu3 }
 0x1d9   : > { %v911_v27 = vadd.f32 %v1723_v14, %v910_v20 }
 0x1da   : > { %v907_v16 = vpop.f32.mrf.mxu0 }
 0x1db   : > { %v926_v17 = vpop.f32.mrf.mxu1  ;;  %v908_v19 = vadd.f32 %v1723_v14, %v907_v16 }
 0x1dd   : > { %v927_v21 = vadd.f32 %v926_v17, %v908_v19 }
 0x1df   : > { %v935_v23 = vmax.f32 %v927_v21, 0.0 }
 0x1e0   : > { %v912_v26 = vpop.f32.mrf.mxu3 }
 0x1e1   : > { %v938_v24 = vpack.c.bf16 %v935_v23, %v934_v22  ;;  %v913_v28 = vadd.f32 %v1723_v14, %v912_v26 }
 0x1e3   : > { %v929_v25 = vpop.f32.mrf.mxu1  ;;  %1016 = vmatmul.bf16.vlgmr.msra.gmra.mxu2 %v938_v24 }
 0x1e4   : > { %v930_v30 = vadd.f32 %v929_v25, %v911_v27 }
 0x1e6   : > { %v936_v33 = vmax.f32 %v930_v30, 0.0 }
 0x1eb   : > { %v931_v29 = vpop.f32.mrf.mxu1 }
 0x1ec   : > { %v932_v31 = vadd.f32 %v931_v29, %v913_v28 }
 0x1ee   : > { %v937_v32 = vmax.f32 %v932_v31, 0.0 }
 0x1f0   : > { %v939_v34 = vpack.c.bf16 %v937_v32, %v936_v33 }
 0x1f3   : > { %1021 = vmatmul.bf16.gmra.mxu2 %v939_v34 }
 0x266   : > { %v1017_v36 = vpop.f32.mrf.mxu2 }
 0x267   : > { %v1018_v37 = vadd.f32 %v1724_v35, %v1017_v36 }
 0x269   : > { %1027 = vmax.xlane.f32.xlu0 %v1018_v37 }
 0x26e   : > { %v1019_v38 = vpop.f32.mrf.mxu2 }
 0x26f   : > { %v1020_v39 = vadd.f32 %v1724_v35, %v1019_v38 }
 0x271   : > { %1029 = vmax.xlane.f32.xlu0 %v1020_v39 }
 0x276   : > { %v1022_v40 = vpop.f32.mrf.mxu2 }
 0x277   : > { %v1023_v41 = vadd.f32 %v1724_v35, %v1022_v40 }
 0x279   : > { %1031 = vmax.xlane.f32.xlu1 %v1023_v41 }
 0x27e   : > { %v1024_v42 = vpop.f32.mrf.mxu2 }
 0x27f   : > { %v1025_v43 = vadd.f32 %v1724_v35, %v1024_v42 }
 0x281   : > { %1033 = vmax.xlane.f32.xlu1 %v1025_v43 }
 0x2dc   : > { %v1028_v44 = vpop.xlane.xlu0 %1027 }
 0x2dd   : > { %v1035_v45 = vsub.f32 %v1018_v37, %v1028_v44 }
 0x2df   : > { %v1039_v46 = vmul.f32 1.442695, %v1035_v45 }
 0x2e1   : > { %1725 = vpow2.f32 %v1039_v46 }
 0x2e4   : > { %v1030_v47 = vpop.xlane.xlu0 %1029 }
 0x2e5   : > { %v1036_v48 = vsub.f32 %v1020_v39, %v1030_v47 }
 0x2e7   : > { %v1726_v49 = vpop.eup %1725  ;;  %v1041_v50 = vmul.f32 1.442695, %v1036_v48 }
 0x2e8   : > { %1047 = vadd.xlane.f32.xlu2 %v1726_v49 }
 0x2e9   : > { %1727 = vpow2.f32 %v1041_v50 }
 0x2ec   : > { %v1032_v51 = vpop.xlane.xlu1 %1031 }
 0x2ed   : > { %v1037_v52 = vsub.f32 %v1023_v41, %v1032_v51 }
 0x2ef   : > { %v1728_v53 = vpop.eup %1727  ;;  %v1043_v54 = vmul.f32 1.442695, %v1037_v52 }
 0x2f0   : > { %1049 = vadd.xlane.f32.xlu2 %v1728_v53 }
 0x2f1   : > { %1729 = vpow2.f32 %v1043_v54 }
 0x2f4   : > { %v1034_v55 = vpop.xlane.xlu1 %1033 }
 0x2f5   : > { %v1038_v56 = vsub.f32 %v1025_v43, %v1034_v55 }
 0x2f7   : > { %v1730_v57 = vpop.eup %1729  ;;  %v1045_v58 = vmul.f32 1.442695, %v1038_v56 }
 0x2f8   : > { %1051 = vadd.xlane.f32.xlu0 %v1730_v57 }
 0x2f9   : > { %1731 = vpow2.f32 %v1045_v58 }
 0x2ff   : > { %v1732_v59 = vpop.eup %1731 }
 0x300   : > { %1053 = vadd.xlane.f32.xlu1 %v1732_v59 }
 0x35b   : > { %v1048_v60 = vpop.xlane.xlu2 %1047 }
 0x35c   : > { %1733 = vlog2.f32 %v1048_v60 }
 0x362   : > { %v1734_v61 = vpop.eup %1733 }
 0x363   : > { %v1056_v62 = vmul.f32 0.6931472, %v1734_v61  ;;  %v1050_v63 = vpop.xlane.xlu2 %1049 }
 0x364   : > { %1735 = vlog2.f32 %v1050_v63 }
 0x365   : > { %v1063_v0 = vadd.f32 %v1056_v62, %v1028_v44 }
 0x367   : > { %v1067_v1 = vsub.f32 %v1018_v37, %v1063_v0 }
 0x369   : > { %1071 = vst [vmem:[%s2322_s27] sm:$0xff] %v1067_v1 }
 0x36a   : > { %v1736_v2 = vpop.eup %1735 }
 0x36b   : > { %v1058_v3 = vmul.f32 0.6931472, %v1736_v2  ;;  %v1052_v4 = vpop.xlane.xlu0 %1051 }
 0x36c   : > { %1737 = vlog2.f32 %v1052_v4 }
 0x36d   : > { %v1064_v5 = vadd.f32 %v1058_v3, %v1030_v47 }
 0x36f   : > { %v1068_v6 = vsub.f32 %v1020_v39, %v1064_v5 }
 0x371   : > { %1072 = vst [vmem:[%s2322_s27 + $0x8] sm:$0xff] %v1068_v6 }
 0x372   : > { %v1738_v7 = vpop.eup %1737 }
 0x373   : > { %v1060_v8 = vmul.f32 0.6931472, %v1738_v7  ;;  %v1054_v9 = vpop.xlane.xlu1 %1053 }
 0x374   : > { %1739 = vlog2.f32 %v1054_v9 }
 0x375   : > { %v1065_v10 = vadd.f32 %v1060_v8, %v1032_v51 }
 0x377   : > { %v1069_v11 = vsub.f32 %v1023_v41, %v1065_v10 }
 0x379   : > { %1073 = vst [vmem:[%s2322_s27 + $0x10] sm:$0xff] %v1069_v11 }
 0x37a   : > { %v1740_v12 = vpop.eup %1739 }
 0x37b   : > { %v1062_v13 = vmul.f32 0.6931472, %v1740_v12 }
 0x37d   : > { %v1066_v14 = vadd.f32 %v1062_v13, %v1034_v55 }
 0x37f   : > { %v1070_v15 = vsub.f32 %v1025_v43, %v1066_v14 }
 0x381   : > { %1074 = vst [vmem:[%s2322_s27 + $0x18] sm:$0xff] %v1070_v15 }
 0x382 PF: > { %s2528_s13 = sld [smem:[#allocation21_spill]]  ;;  %s1088_s0 = sshll.u32 %s2322_s27, 4  ;;  %s1089_s0 = int_to_ptr.vmem [resolvable:$true] %s1088_s0 }
 0x383   : > { %s2530_s7 = sld [smem:[#allocation35_spill]]  ;;  %s1076_s30 = scalar_lea.sflag [#allocation5], %s403_s18 }
 0x388   : > { %s1542_s6 = sshll.u32 %s2528_s13, 5 }
 0x389   : > { %s1087_s9 = scalar_lea.hbm %s2530_s7, %s1542_s6  ;;  %s1911_s3 = scalar_lea.hbm %s2530_s7, 64 }
 0x38a   : > { %s1090_s16 = sshll.u32 %s1087_s9, 4  ;;  %s1091_s16 = int_to_ptr.hbm [resolvable:$true] %s1090_s16 }
 0x38b   : > { %s1905_s4 = sshra.s32 %s1091_s16, 4  ;;  %s1906_s4 = int_to_ptr.hbm [resolvable:$true] %s1905_s4 }
 0x38c   : > { %s1907_s17 = scalar_lea.hbm %s1906_s4, 32  ;;  %p1912_p10 = scmp.lt.s32.totalorder %s1906_s4, %s2530_s7 }
 0x38d   : > { %p1908_p5 = scmp.ne.s32.totalorder %s1906_s4, %s1907_s17  ;;  %p1913_p0 = scmp.lt.s32.totalorder %s1911_s3, %s1907_s17 }
 0x38f   : > { %p1909_p13 = pnand %p1908_p5, %p2195_p9  ;;  %p1914_p4 = por %p1913_p0, %p1912_p10 }
 0x391   : > { %p1910_p7 = pneg %p1909_p13 }
 0x393   : > { %p1915_p6 = pnand %p1914_p4, %p1910_p7 }
 0x395   : > { %1918 = shalt.err (!%p1915_p6)
}
 0x396   : > { %s2062_s18 = smov 128   ;;  %s2063_s27 = smov 8  }
 0x397   : > { %1567 = dma.vmem_to_hbm [thread:$0]  (%p2195_p9), %s1089_s0, 512, %s1091_s16, %s1076_s30, %s2062_s18, %s2062_s18, %s2063_s27  }
 0x398 PF: > { %s2531_s24 = sld [smem:[#allocation18_spill]]  ;;  %p1597_p8 = scmp.ge.s32.totalorder %s2049_s14, 2 }
 0x39a   : > { %p1587_p2 = pnand %p1597_p8, %p2200_p11 }
 0x39c   : > { %p1588_p12 = pneg %p1587_p2 }
 0x39e   : > { %s1105_s10 = sand.u32 1, %s2531_s24  }
 0x39f   : > { %s1106_s13 = scalar_lea.sflag [#allocation5], %s1105_s10 }
 0x3a0   : > { %1992 = dma.done.wait (%p1588_p12), %s1106_s13, 512  }
 0x3a1   : > { %1994 = vsyncadd (%p1588_p12), %s1106_s13, 4294966784  ;;  %s27_s14 = sadd.s32 1, %s2049_s14   ;;  %s2534_s2 = sld [smem:[#allocation27_spill]] }
 0x3a2   : > { %p2430_p3 = scmp.ge.s32.totalorder %s27_s14, 6   ;;  %s2535_s5 = sld [smem:[#allocation19_spill]] }
 0x3a3   : > { %s2536_s9 = sld [smem:[#allocation28_spill]]  ;;  %s2540_s24 = smov %s2001_s25 }
 0x3a4   : > { %s2537_s11 = sld [smem:[#allocation22_spill]]  ;;  %s2541_s25 = smov %s2005_s26 }
 0x3a5   : > { %s2538_s20 = sld [smem:[#allocation25_spill]]  ;;  %s2543_s27 = smov %s2013_s28 }
 0x3a6   : > { %s2539_s13 = sld [smem:[#allocation26_spill]]  ;;  %s2544_s28 = smov %s2017_s29 }
 0x3a7   : > { %s2542_s26 = smov %s2534_s2  ;;  %s2545_s29 = smov %s2283_s23 }
 0x3a8   : > { %s2546_s30 = smov %s2025_s8  ;;  %s2547_s8 = smov %s2535_s5 }
 0x3a9   : > { %s2548_s10 = smov %s2041_s12  ;;  %26 = sbr.rel (!%p2430_p3) target bundleno = 21 (0x15), region = 126 }
 0x3ab   : > { %s2549_s12 = smov %s2538_s20 }
 0x3ae   :  { %1112 = vsyncpa [#allocation4], 1 }
 0x3af   :  { %1114 = vsyncpa [#allocation4 + $0x1], 1 }
 0x3b0   :  { %1115 = vsyncpa [#allocation7], 1 }
 0x3b1   :  { %1117 = vsyncpa [#allocation7 + $0x1], 1 }
 0x3b2   :  { %1118 = vsyncpa [#allocation10], 1 }
 0x3b3   :  { %1119 = vsyncpa [#allocation5], 1 }
 0x3b4   :  { %1121 = vsyncpa [#allocation5 + $0x1], 1 }

// kernel: tpu_custom_call.1
= control target key start
LH: loop header
LB: loop body
LE: loop exit
PB: predicated region body
PF: predicated region fallthrough
CT: control target
= control target key end

     0   :  { %s2477_s0 = inlined_call_operand.hbm [shape: f32[64,512], index: 0, kind: input, shape index: {}]   ;;  %s2478_s1 = inlined_call_operand.hbm [shape: bf16[512,256], index: 1, kind: input, shape index: {}]   ;;  %s2479_s2 = inlined_call_operand.hbm [shape: f32[1,256], index: 2, kind: input, shape index: {}]   ;;  %s2480_s3 = inlined_call_operand.hbm [shape: bf16[256,128], index: 3, kind: input, shape index: {}]   ;;  %s2481_s4 = inlined_call_operand.vmem [shape: f32[1,128], index: 4, kind: input, shape index: {}]   ;;  %s2482_s5 = inlined_call_operand.hbm [shape: bf16[128,128], index: 5, kind: input, shape index: {}]   ;;  %s2483_s6 = inlined_call_operand.vmem [shape: f32[1,128], index: 6, kind: input, shape index: {}]   ;;  %s2484_s7 = inlined_call_operand.hbm [shape: f32[64,128], index: 7, kind: output, shape index: {}]  }
   0x1   :  { %2494 = sst [smem:[#allocation29_spill]] %s2477_s0 }
   0x2   :  { %2495 = sst [smem:[#allocation30_spill]] %s2479_s2 }
   0x3   :  { %2496 = sst [smem:[#allocation31_spill]] %s2480_s3 }
   0x4   :  { %2497 = sst [smem:[#allocation32_spill]] %s2481_s4 }
   0x5   :  { %2498 = sst [smem:[#allocation33_spill]] %s2482_s5 }
   0x6   :  { %2499 = sst [smem:[#allocation34_spill]] %s2483_s6 }
   0x7   :  { %2500 = sst [smem:[#allocation35_spill]] %s2484_s7 }
   0x8   :  { %12 = vsyncpa [#allocation4], 0 }
   0x9   :  { %14 = vsyncpa [#allocation4 + $0x1], 0 }
   0xa   :  { %15 = vsyncpa [#allocation7], 0 }
   0xb   :  { %17 = vsyncpa [#allocation7 + $0x1], 0 }
   0xc   :  { %18 = vsyncpa [#allocation10], 0 }
   0xd   :  { %19 = vsyncpa [#allocation5], 0 }
   0xe   :  { %21 = vsyncpa [#allocation5 + $0x1], 0  ;;  %s2104_s24 = smov 0   ;;  %s2106_s25 = smov 0  }
   0xf   :  { %s2108_s26 = smov 0   ;;  %s2110_s27 = smov 0  }
  0x10   :  { %s2112_s28 = smov 0   ;;  %s2114_s29 = smov 0  }
  0x11   :  { %s2116_s30 = smov 0   ;;  %s2118_s8 = smov 0  }
  0x12   :  { %s2120_s9 = smov 0   ;;  %s2122_s10 = smov 0  }
  0x13   :  { %s2124_s11 = smov 0   ;;  %s2126_s12 = smov 0  }
  0x14   :  { %s2128_s13 = smov 0   ;;  %s2130_s14 = smov 0  }
  0x15 LB: > { %2501 = sst [smem:[#allocation18_spill]] %s1997_s24  ;;  %s2171_s15 = sadd.s32 4294967295, %s2049_s14   ;;  %s2049_s14 = sphi %s2130_s14, %s27_s14   ;;  %s2045_s13 = sphi %s2128_s13, %s2539_s13   ;;  %s2041_s12 = sphi %s2126_s12, %s2549_s12   ;;  %s2037_s11 = sphi %s2124_s11, %s2537_s11   ;;  %s2033_s10 = sphi %s2122_s10, %s2548_s10   ;;  %s2029_s9 = sphi %s2120_s9, %s2536_s9   ;;  %s2025_s8 = sphi %s2118_s8, %s2547_s8   ;;  %s2021_s30 = sphi %s2116_s30, %s2546_s30   ;;  %s2017_s29 = sphi %s2114_s29, %s2545_s29   ;;  %s2013_s28 = sphi %s2112_s28, %s2544_s28   ;;  %s2009_s27 = sphi %s2110_s27, %s2543_s27   ;;  %s2005_s26 = sphi %s2108_s26, %s2542_s26   ;;  %s2001_s25 = sphi %s2106_s25, %s2541_s25   ;;  %s1997_s24 = sphi %s2104_s24, %s2540_s24  }
  0x16   : > { %2502 = sst [smem:[#allocation19_spill]] %s2029_s9  ;;  %s1230_s16 = sadd.s32 4294967294, %s2049_s14  }
  0x17   : > { %2503 = sst [smem:[#allocation20_spill]] %s2033_s10  ;;  %p61_p0 = scmp.ne.s32.totalorder %s2025_s8, %s2021_s30 }
  0x18   : > { %2504 = sst [smem:[#allocation21_spill]] %s2037_s11  ;;  %p62_p1 = scmp.eq.s32.totalorder %s2171_s15, 0 }
  0x19   : > { %2505 = sst [smem:[#allocation22_spill]] %s2045_s13  ;;  %p87_p2 = scmp.ne.s32.totalorder %s2013_s28, %s2009_s27 }
  0x1a   : > { %p2180_p3 = por %p62_p1, %p61_p0  ;;  %p215_p4 = scmp.ne.s32.totalorder %s2005_s26, %s2001_s25 }
  0x1b   : > { %p2188_p5 = por %p87_p2, %p62_p1  ;;  %p216_p6 = scmp.eq.s32.totalorder %s2171_s15, 3 }
  0x1c   : > { %p221_p7 = scmp.ne.s32.totalorder %s2001_s25, %s1997_s24  ;;  %p222_p8 = scmp.eq.s32.totalorder %s1230_s16, 3 }
  0x1d   : > { %p2195_p9 = por %p216_p6, %p215_p4  ;;  %p1231_p10 = scmp.ge.s32.totalorder %s2049_s14, 1 }
  0x1e   : > { %p2200_p11 = por %p222_p8, %p221_p7  ;;  %p229_p12 = scmp.lt.s32.totalorder %s2049_s14, 5 }
  0x1f   : > { %s2508_s20 = scalar_select %p2195_p9, 1, 0 }
  0x20   : > { %s2510_s21 = scalar_select %p2200_p11, 1, 0 }
  0x21   : > { %2509 = sst [smem:[#allocation23_spill]] %s2508_s20  ;;  %p2208_p13 = pnand %p1231_p10, %p229_p12 }
  0x22   : > { %2511 = sst [smem:[#allocation24_spill]] %s2510_s21  ;;  %s2051_s16 = smov [#allocation8]  }
  0x23   : > { %s2512_s2 = sld [smem:[#allocation30_spill]]  ;;  %p1569_p0 = pneg %p2208_p13 }
  0x24   : > { %s243_s17 = sshll.u32 %s2051_s16, 4  ;;  %s2514_s3 = sld [smem:[#allocation31_spill]]  ;;  %s244_s17 = int_to_ptr.vmem [resolvable:$true] %s243_s17 }
  0x25   : > { %p2219_p2 = pnand %p1569_p0, %p62_p1  ;;  %s2052_s23 = smov [#allocation9]  }
  0x26   : > { %s2053_s7 = smov 64   ;;  %s2054_s24 = smov 4  }
  0x27   : > { %s2516_s5 = sld [smem:[#allocation33_spill]]  ;;  %s2055_s11 = smov [#allocation11]  }
  0x28   : > { %s48_s6 = sadd.s32 1, %s2029_s9  ;;  %p55_p6 = scmp.ne.s32.totalorder %s2029_s9, %s2025_s8 }
  0x29   : > { %s241_s27 = sshll.u32 %s2512_s2, 4  ;;  %s254_s2 = sshll.u32 %s2052_s23, 4  ;;  %s242_s27 = int_to_ptr.hbm [resolvable:$true] %s241_s27  ;;  %s255_s2 = int_to_ptr.vmem [resolvable:$true] %s254_s2 }
  0x2a   : > { %s252_s21 = sshll.u32 %s2514_s3, 4  ;;  %s271_s23 = sshll.u32 %s2055_s11, 4  ;;  %s253_s21 = int_to_ptr.hbm [resolvable:$true] %s252_s21  ;;  %s272_s23 = int_to_ptr.vmem [resolvable:$true] %s271_s23 }
  0x2b   : > { %1572 = dma.hbm_to_vmem [thread:$0]  (!%p2219_p2), %s242_s27, 32, %s244_s17, [#allocation7]  }
  0x2c   : > { %1575 = dma.hbm_to_vmem [thread:$0]  (!%p2219_p2), %s253_s21, 2048, %s255_s2, [#allocation10], %s2053_s7, %s2053_s7, %s2054_s24  }
  0x2d   : > { %s269_s20 = sshll.u32 %s2516_s5, 4  ;;  %s36_s17 = sadd.s32 1, %s2041_s12  ;;  %s270_s20 = int_to_ptr.hbm [resolvable:$true] %s269_s20 }
  0x2e   : > { %1578 = dma.hbm_to_vmem [thread:$0]  (!%p2219_p2), %s270_s20, 1024, %s272_s23, [#allocation10], %s2053_s7, %s2053_s7, %s2054_s24  }
  0x2f   : > { %p37_p4 = scmp.ge.s32.totalorder %s36_s17, 2  ;;  %s39_s27 = sadd.s32 1, %s2045_s13 }
  0x30   : > { %p56_p7 = scmp.eq.s32.totalorder %s2049_s14, 0  ;;  %p1593_p0 = scmp.lt.s32.totalorder %s2049_s14, 4 }
  0x31   : > { %s2551_s17 = smov (%p37_p4, %s36_s17), 0  ;;  %s2553_s27 = smov (!%p37_p4, %s39_s27), %s2045_s13 }
  0x32   : > { %2517 = sst [smem:[#allocation25_spill]] %s2551_s17  ;;  %s2242_s2 = ssub.s32 %s2041_s12, %s2551_s17 }
  0x33   : > { %p41_p8 = scmp.ge.s32.totalorder %s2553_s27, 2  ;;  %p72_p10 = scmp.eq.s32.totalorder %s2242_s2, 0 }
  0x34   : > { %p2248_p12 = por %p56_p7, %p55_p6  ;;  %s288_s11 = sand.u32 1, %s2029_s9  }
  0x35   : > { %s2555_s27 = smov (%p41_p8, %s2553_s27), 0  ;;  %s1238_s20 = sshll.u32 %s2041_s12, 1 }
  0x36   : > { %2519 = sst [smem:[#allocation26_spill]] %s2555_s27  ;;  %s43_s21 = ssub.s32 %s2045_s13, %s2555_s27 }
  0x37   : > { %s45_s22 = sor.u32 %s2242_s2, %s43_s21  ;;  %p203_p2 = scmp.eq.s32.totalorder %s43_s21, 0 }
  0x38   : > { %p46_p4 = scmp.eq.s32.totalorder %s45_s22, 0  ;;  %s1236_s7 = sshll.u32 %s288_s11, 6 }
  0x39   : > { %s2520_s24 = sadd.s32 1, %s2005_s26  ;;  %s1483_s5 = sshll.u32 %s2045_s13, 4 }
  0x3a   : > { %s2263_s16 = scalar_select %p203_p2, %s2005_s26, %s2520_s24  }
  0x3b   : > { %s2266_s23 = scalar_select %p46_p4, %s2029_s9, %s48_s6  }
  0x3c   : > { %2521 = sst [smem:[#allocation27_spill]] %s2263_s16  ;;  %s298_s17 = sadd.s32 %s1483_s5, %s1238_s20 }
  0x3d   : > { %2522 = sst [smem:[#allocation28_spill]] %s2266_s23  ;;  %s292_s4 = scalar_lea.vmem [#allocation3], %s1236_s7 }
  0x3e   : > { %s303_s10 = sshll.u32 %s292_s4, 4  ;;  %s1240_s27 = sshll.u32 %s298_s17, 3  ;;  %s304_s10 = int_to_ptr.vmem [resolvable:$true] %s303_s10 }
  0x3f   : > { %s2523_s0 = sld [smem:[#allocation29_spill]]  ;;  %p1580_p6 = pnand %p1593_p0, %p2248_p12 }
  0x40   : > { %s289_s5 = scalar_lea.sflag [#allocation4], %s288_s11  ;;  %s2056_s20 = smov 512  }
  0x41   : > { %s2057_s7 = smov 256   ;;  %s2058_s13 = smov 16  }
  0x42   : > { %s313_s4 = sand.u32 1, %s2049_s14   ;;  %s74_s17 = sadd.s32 1, %s2017_s29 }
  0x43   : > { %p81_p8 = scmp.ne.s32.totalorder %s2017_s29, %s2013_s28  ;;  %s1485_s21 = sshll.u32 %s2041_s12, 8 }
  0x44   : > { %s2283_s23 = scalar_select %p72_p10, %s2017_s29, %s74_s17  }
  0x45   : > { %s300_s24 = scalar_lea.hbm %s2523_s0, %s1240_s27  ;;  %p83_p2 = por %p81_p8, %p56_p7 }
  0x46   : > { %s301_s6 = sshll.u32 %s300_s24, 4  ;;  %s315_s27 = sand.u32 1, %s2017_s29   ;;  %s302_s6 = int_to_ptr.hbm [resolvable:$true] %s301_s6 }
  0x47   : > { %1582 = dma.hbm_to_vmem [thread:$0]  (!%p1580_p6), %s302_s6, 1024, %s304_s10, %s289_s5, %s2056_s20, %s2057_s7, %s2058_s13  }
  0x48   : > { %s1241_s3 = sshll.u32 %s315_s27, 8  ;;  %s323_s11 = scalar_lea.hbm %s2478_s1, %s1485_s21 }
  0x49   : > { %s324_s0 = sshll.u32 %s323_s11, 4  ;;  %s317_s9 = scalar_lea.vmem [#allocation6], %s1241_s3  ;;  %s325_s0 = int_to_ptr.hbm [resolvable:$true] %s324_s0 }
  0x4a   : > { %s326_s16 = sshll.u32 %s317_s9, 4  ;;  %p1583_p12 = pnand %p1593_p0, %p83_p2  ;;  %s327_s16 = int_to_ptr.vmem [resolvable:$true] %s326_s16 }
  0x4b   : > { %s314_s10 = scalar_lea.sflag [#allocation7], %s313_s4  ;;  %s2059_s13 = smov 128  }
  0x4c   : > { %s2060_s2 = smov 8   ;;  %338 = sbr.rel (%p2208_p13) target bundleno = 920 (0x398), region = 48 }
  0x4d   : > { %1585 = dma.hbm_to_vmem [thread:$0]  (!%p1583_p12), %s325_s0, 4096, %s327_s16, %s314_s10, %s2059_s13, %s2059_s13, %s2060_s2  }
  0x4e   : > { %s340_s6 = sand.u32 (!%p2208_p13), 1, %s2025_s8  }
  0x4f   : > { %s1246_s5 = sshll.u32 (!%p2208_p13), %s340_s6, 6  ;;  %s341_s20 = scalar_lea.sflag (!%p2208_p13), [#allocation4], %s340_s6 }
  0x50   : > { %s2297_s7 = scalar_lea.vmem (!%p2208_p13), [#allocation3], %s1246_s5 }
  0x51   : > { %1976 = dma.done.wait (%p2180_p3), %s341_s20, 1024  }
  0x52   : > { %1978 = vsyncadd (%p2180_p3), %s341_s20, 4294966272  ;;  %s350_s9 = sand.u32 1, %s2171_s15   ;;  %s352_s0 = sand.u32 1, %s2013_s28  }
  0x53   : > { %s1247_s16 = sshll.u32 %s352_s0, 8  ;;  %s351_s30 = scalar_lea.sflag [#allocation7], %s350_s9 }
  0x54   : > { %s2305_s4 = scalar_lea.vmem [#allocation6], %s1247_s16 }
  0x55   : > { %1980 = dma.done.wait (%p2188_p5), %s351_s30, 4096  }
  0x56   : > { %1982 = vsyncadd (%p2188_p5), %s351_s30, 4294963200 }
  0x57   : > { %1984 = dma.done.wait (%p62_p1), [#allocation7], 32  }
  0x58   : > { %1986 = vsyncadd (%p62_p1), [#allocation7], 4294967264 }
  0x59   : > { %1988 = dma.done.wait (%p62_p1), [#allocation10], 3072  }
  0x5a   : > { %1990 = vsyncadd (%p62_p1), [#allocation10], 4294964224  ;;  %s403_s18 = sand.u32 1, %s2001_s25   ;;  %s2524_s19 = sld [smem:[#allocation20_spill]] }
  0x5b   : > { %s1251_s17 = sshll.u32 %s403_s18, 5 }
  0x5c   : > { %s2322_s27 = scalar_lea.vmem [#allocation12], %s1251_s17 }
  0x60   : > { %p1252_p3 = scmp.ne.s32.totalorder %s2524_s19, 0 }
  0x62   : > { %413 = sbr.rel (%p1252_p3) target bundleno = 112 (0x70), region = 72 }
  0x67   : > { %v2061_v0 = vmov 0.0  }
  0x68   : > { %414 = vst [vmem:[#allocation2 + $0x30] sm:$0xff] %v2061_v0 }
  0x69   : > { %415 = vst [vmem:[#allocation2] sm:$0xff] %v2061_v0 }
  0x6a   : > { %416 = vst [vmem:[#allocation2 + $0x18] sm:$0xff] %v2061_v0 }
  0x6b   : > { %417 = vst [vmem:[#allocation2 + $0x10] sm:$0xff] %v2061_v0 }
  0x6c   : > { %418 = vst [vmem:[#allocation2 + $0x8] sm:$0xff] %v2061_v0 }
  0x6d   : > { %419 = vst [vmem:[#allocation2 + $0x20] sm:$0xff] %v2061_v0 }
  0x6e   : > { %420 = vst [vmem:[#allocation2 + $0x28] sm:$0xff] %v2061_v0 }
  0x6f   : > { %421 = vst [vmem:[#allocation2 + $0x38] sm:$0xff] %v2061_v0 }
  0x70 PF: > { %v1311_v1 = vld [vmem:[%s2305_s4 + $0x70] sm:$0xf]  ;;  %v1501_v2 = vld [vmem:[%s2305_s4 + $0x74] sm:$0xf0]  ;;  %v1500_v6 = vld [vmem:[%s2305_s4 + $0x74] sm:$0xf] }
  0x71   : > { %v1375_v3 = vld [vmem:[%s2305_s4 + $0xf0] sm:$0xf]  ;;  %v1312_v4 = vor.u32 %v1501_v2, %v1311_v1  ;;  %v1517_v5 = vld [vmem:[%s2305_s4 + $0xf4] sm:$0xf0]  ;;  %v1313_v7 = vld [vmem:[%s2305_s4 + $0x78] sm:$0xf0] }
  0x72   : > { %v1376_v8 = vor.u32 %v1517_v5, %v1375_v3  ;;  %v1316_v9 = vor.u32 %v1500_v6, %v1313_v7  ;;  %v1516_v10 = vld [vmem:[%s2305_s4 + $0xf4] sm:$0xf]  ;;  %v1377_v11 = vld [vmem:[%s2305_s4 + $0xf8] sm:$0xf0]  ;;  %v1303_v12 = vld [vmem:[%s2305_s4 + $0x60] sm:$0xf] }
  0x73   : > { %634 = vmatpush.bf16.msra.mxu0 %v1312_v4  ;;  %v1380_v13 = vor.u32 %v1516_v10, %v1377_v11  ;;  %v1499_v14 = vld [vmem:[%s2305_s4 + $0x64] sm:$0xf0]  ;;  %v1367_v15 = vld [vmem:[%s2305_s4 + $0xe0] sm:$0xf]  ;;  %v1498_v19 = vld [vmem:[%s2305_s4 + $0x64] sm:$0xf] }
  0x74   : > { %v1515_v16 = vld [vmem:[%s2305_s4 + $0xe4] sm:$0xf0]  ;;  %653 = vmatpush.bf16.msra.mxu1 %v1376_v8  ;;  %672 = vmatpush.bf16.msra.mxu2 %v1316_v9  ;;  %v1304_v17 = vor.u32 %v1499_v14, %v1303_v12  ;;  %v1305_v20 = vld [vmem:[%s2305_s4 + $0x68] sm:$0xf0]  ;;  %v1514_v21 = vld [vmem:[%s2305_s4 + $0xe4] sm:$0xf] }
  0x75   : > { %v1368_v18 = vor.u32 %v1515_v16, %v1367_v15  ;;  %691 = vmatpush.bf16.msra.mxu3 %v1380_v13  ;;  %v1308_v22 = vor.u32 %v1498_v19, %v1305_v20  ;;  %v1369_v23 = vld [vmem:[%s2305_s4 + $0xe8] sm:$0xf0]  ;;  %v1295_v24 = vld [vmem:[%s2305_s4 + $0x50] sm:$0xf]  ;;  %v1497_v25 = vld [vmem:[%s2305_s4 + $0x54] sm:$0xf0] }
  0x76   : > { %v1372_v26 = vor.u32 %v1514_v21, %v1369_v23  ;;  %v1359_v27 = vld [vmem:[%s2305_s4 + $0xd0] sm:$0xf]  ;;  %v1513_v28 = vld [vmem:[%s2305_s4 + $0xd4] sm:$0xf0]  ;;  %v1496_v29 = vld [vmem:[%s2305_s4 + $0x54] sm:$0xf]  ;;  %v1296_v30 = vor.u32 %v1497_v25, %v1295_v24 }
  0x77   : > { %635 = vmatpush.bf16.msra.mxu0 %v1304_v17  ;;  %v1297_v31 = vld [vmem:[%s2305_s4 + $0x58] sm:$0xf0]  ;;  %v1512_v32 = vld [vmem:[%s2305_s4 + $0xd4] sm:$0xf]  ;;  %v1360_v34 = vor.u32 %v1513_v28, %v1359_v27  ;;  %v1287_v36 = vld [vmem:[%s2305_s4 + $0x40] sm:$0xf] }
  0x78   : > { %v1361_v33 = vld [vmem:[%s2305_s4 + $0xd8] sm:$0xf0]  ;;  %654 = vmatpush.bf16.msra.mxu1 %v1368_v18  ;;  %673 = vmatpush.bf16.msra.mxu2 %v1308_v22  ;;  %v1300_v35 = vor.u32 %v1496_v29, %v1297_v31  ;;  %v1495_v37 = vld [vmem:[%s2305_s4 + $0x44] sm:$0xf0]  ;;  %v1351_v38 = vld [vmem:[%s2305_s4 + $0xc0] sm:$0xf] }
  0x79   : > { %692 = vmatpush.bf16.msra.mxu3 %v1372_v26  ;;  %v1364_v39 = vor.u32 %v1512_v32, %v1361_v33  ;;  %v1511_v40 = vld [vmem:[%s2305_s4 + $0xc4] sm:$0xf0]  ;;  %v1494_v41 = vld [vmem:[%s2305_s4 + $0x44] sm:$0xf]  ;;  %v1289_v42 = vld [vmem:[%s2305_s4 + $0x48] sm:$0xf0]  ;;  %v1288_v45 = vor.u32 %v1495_v37, %v1287_v36 }
  0x7a   : > { %v1510_v43 = vld [vmem:[%s2305_s4 + $0xc4] sm:$0xf]  ;;  %v1353_v44 = vld [vmem:[%s2305_s4 + $0xc8] sm:$0xf0]  ;;  %v1352_v46 = vor.u32 %v1511_v40, %v1351_v38  ;;  %v1292_v47 = vor.u32 %v1494_v41, %v1289_v42  ;;  %v1279_v48 = vld [vmem:[%s2305_s4 + $0x30] sm:$0xf] }
  0x7b   : > { %636 = vmatpush.bf16.msra.mxu0 %v1296_v30  ;;  %v1493_v49 = vld [vmem:[%s2305_s4 + $0x34] sm:$0xf0]  ;;  %v1343_v50 = vld [vmem:[%s2305_s4 + $0xb0] sm:$0xf]  ;;  %v1356_v51 = vor.u32 %v1510_v43, %v1353_v44  ;;  %v1492_v53 = vld [vmem:[%s2305_s4 + $0x34] sm:$0xf] }
  0x7c   : > { %655 = vmatpush.bf16.msra.mxu1 %v1360_v34  ;;  %674 = vmatpush.bf16.msra.mxu2 %v1300_v35  ;;  %v1509_v52 = vld [vmem:[%s2305_s4 + $0xb4] sm:$0xf0]  ;;  %v1281_v54 = vld [vmem:[%s2305_s4 + $0x38] sm:$0xf0]  ;;  %v1508_v55 = vld [vmem:[%s2305_s4 + $0xb4] sm:$0xf]  ;;  %v1280_v57 = vor.u32 %v1493_v49, %v1279_v48 }
  0x7d   : > { %693 = vmatpush.bf16.msra.mxu3 %v1364_v39  ;;  %v1345_v56 = vld [vmem:[%s2305_s4 + $0xb8] sm:$0xf0]  ;;  %v1344_v58 = vor.u32 %v1509_v52, %v1343_v50  ;;  %v1284_v59 = vor.u32 %v1492_v53, %v1281_v54  ;;  %v1271_v60 = vld [vmem:[%s2305_s4 + $0x20] sm:$0xf]  ;;  %v1491_v61 = vld [vmem:[%s2305_s4 + $0x24] sm:$0xf0] }
  0x7e   : > { %v1335_v62 = vld [vmem:[%s2305_s4 + $0xa0] sm:$0xf]  ;;  %v1348_v63 = vor.u32 %v1508_v55, %v1345_v56  ;;  %v1507_v0 = vld [vmem:[%s2305_s4 + $0xa4] sm:$0xf0]  ;;  %v1490_v1 = vld [vmem:[%s2305_s4 + $0x24] sm:$0xf]  ;;  %v1272_v5 = vor.u32 %v1491_v61, %v1271_v60 }
  0x7f   : > { %637 = vmatpush.bf16.msra.mxu0 %v1288_v45  ;;  %v1273_v2 = vld [vmem:[%s2305_s4 + $0x28] sm:$0xf0]  ;;  %v1506_v3 = vld [vmem:[%s2305_s4 + $0xa4] sm:$0xf]  ;;  %v1336_v6 = vor.u32 %v1507_v0, %v1335_v62  ;;  %v1263_v8 = vld [vmem:[%s2305_s4 + $0x10] sm:$0xf] }
  0x80   : > { %656 = vmatpush.bf16.msra.mxu1 %v1352_v46  ;;  %675 = vmatpush.bf16.msra.mxu2 %v1292_v47  ;;  %v1337_v4 = vld [vmem:[%s2305_s4 + $0xa8] sm:$0xf0]  ;;  %v1276_v7 = vor.u32 %v1490_v1, %v1273_v2  ;;  %v1489_v9 = vld [vmem:[%s2305_s4 + $0x14] sm:$0xf0]  ;;  %v1327_v10 = vld [vmem:[%s2305_s4 + $0x90] sm:$0xf] }
  0x81   : > { %694 = vmatpush.bf16.msra.mxu3 %v1356_v51  ;;  %v1340_v11 = vor.u32 %v1506_v3, %v1337_v4  ;;  %v1505_v12 = vld [vmem:[%s2305_s4 + $0x94] sm:$0xf0]  ;;  %v1488_v13 = vld [vmem:[%s2305_s4 + $0x14] sm:$0xf]  ;;  %v1265_v14 = vld [vmem:[%s2305_s4 + $0x18] sm:$0xf0]  ;;  %v1264_v17 = vor.u32 %v1489_v9, %v1263_v8 }
  0x82   : > { %v1504_v15 = vld [vmem:[%s2305_s4 + $0x94] sm:$0xf]  ;;  %v1329_v16 = vld [vmem:[%s2305_s4 + $0x98] sm:$0xf0]  ;;  %v1328_v18 = vor.u32 %v1505_v12, %v1327_v10  ;;  %v1268_v19 = vor.u32 %v1488_v13, %v1265_v14  ;;  %v1255_v20 = vld [vmem:[%s2305_s4] sm:$0xf] }
  0x83   : > { %638 = vmatpush.bf16.msra.mxu0 %v1280_v57  ;;  %v1487_v21 = vld [vmem:[%s2305_s4 + $0x4] sm:$0xf0]  ;;  %v1319_v22 = vld [vmem:[%s2305_s4 + $0x80] sm:$0xf]  ;;  %v1332_v23 = vor.u32 %v1504_v15, %v1329_v16  ;;  %v1486_v25 = vld [vmem:[%s2305_s4 + $0x4] sm:$0xf] }
  0x84   : > { %657 = vmatpush.bf16.msra.mxu1 %v1344_v58  ;;  %676 = vmatpush.bf16.msra.mxu2 %v1284_v59  ;;  %v1503_v24 = vld [vmem:[%s2305_s4 + $0x84] sm:$0xf0]  ;;  %v1257_v26 = vld [vmem:[%s2305_s4 + $0x8] sm:$0xf0]  ;;  %v1502_v27 = vld [vmem:[%s2305_s4 + $0x84] sm:$0xf]  ;;  %v1256_v29 = vor.u32 %v1487_v21, %v1255_v20 }
  0x85   : > { %695 = vmatpush.bf16.msra.mxu3 %v1348_v63  ;;  %v1321_v28 = vld [vmem:[%s2305_s4 + $0x88] sm:$0xf0]  ;;  %v430_v30 = vld [vmem:[%s2297_s7] sm:$0xff]  ;;  %v432_v31 = vld [vmem:[%s2297_s7 + $0x10] sm:$0xff]  ;;  %v1320_v32 = vor.u32 %v1503_v24, %v1319_v22  ;;  %v1260_v33 = vor.u32 %v1486_v25, %v1257_v26  ;;  %s2525_s15 = sld [smem:[#allocation20_spill]] }
  0x86   : > { %v431_v34 = vld [vmem:[%s2297_s7 + $0x8] sm:$0xff]  ;;  %v433_v35 = vld [vmem:[%s2297_s7 + $0x18] sm:$0xff]  ;;  %v1324_v36 = vor.u32 %v1502_v27, %v1321_v28  ;;  %v438_v37 = vpack.c.bf16 %v432_v31, %v430_v30  ;;  %v434_v39 = vld [vmem:[%s2297_s7 + $0x20] sm:$0xff] }
  0x87   : > { %639 = vmatpush.bf16.msra.mxu0 %v1272_v5  ;;  %v439_v38 = vpack.c.bf16 %v433_v35, %v431_v34  ;;  %v436_v40 = vld [vmem:[%s2297_s7 + $0x30] sm:$0xff]  ;;  %v435_v41 = vld [vmem:[%s2297_s7 + $0x28] sm:$0xff]  ;;  %v437_v42 = vld [vmem:[%s2297_s7 + $0x38] sm:$0xff] }
  0x88   : > { %658 = vmatpush.bf16.msra.mxu1 %v1336_v6  ;;  %677 = vmatpush.bf16.msra.mxu2 %v1276_v7  ;;  %v440_v43 = vpack.c.bf16 %v436_v40, %v434_v39  ;;  %v441_v44 = vpack.c.bf16 %v437_v42, %v435_v41  ;;  %v422_v46 = vld [vmem:[#allocation2 + $0x30] sm:$0xff]  ;;  %v423_v51 = vld [vmem:[#allocation2] sm:$0xff]  ;;  %v424_v55 = vld [vmem:[#allocation2 + $0x18] sm:$0xff] }
  0x89   : > { %696 = vmatpush.bf16.msra.mxu3 %v1340_v11  ;;  %v425_v61 = vld [vmem:[#allocation2 + $0x10] sm:$0xff]  ;;  %v426_v1 = vld [vmem:[#allocation2 + $0x8] sm:$0xff]  ;;  %v427_v7 = vld [vmem:[#allocation2 + $0x20] sm:$0xff] }
  0x8a   : > { %v428_v11 = vld [vmem:[#allocation2 + $0x28] sm:$0xff] }
  0x8b   : > { %640 = vmatpush.bf16.msra.mxu0 %v1264_v17  ;;  %v429_v17 = vld [vmem:[#allocation2 + $0x38] sm:$0xff]  ;;  %p1381_p1 = scmp.ne.s32.totalorder %s2525_s15, 1 }
  0x8c   : > { %659 = vmatpush.bf16.msra.mxu1 %v1328_v18  ;;  %678 = vmatpush.bf16.msra.mxu2 %v1268_v19  ;;  %s2526_s22 = sld [smem:[#allocation32_spill]] (!%p1381_p1) }
  0x8d   : > { %697 = vmatpush.bf16.msra.mxu3 %v1332_v23  ;;  %s2527_s10 = sld [smem:[#allocation34_spill]] (!%p1381_p1) }
  0x8f   : > { %641 = vmatpush.bf16.msra.mxu0 %v1256_v29 }
  0x90   : > { %660 = vmatpush.bf16.msra.mxu1 %v1320_v32  ;;  %679 = vmatpush.bf16.msra.mxu2 %v1260_v33 }
  0x91   : > { %698 = vmatpush.bf16.msra.mxu3 %v1324_v36 }
  0x92   : > { %642 = vmatmul.bf16.vlgmr.msra.gmra.mxu0 %v438_v37 }
  0x93   : > { %661 = vmatmul.bf16.vlgmr.msra.gmra.mxu1 %v439_v38  ;;  %680 = vmatmul.bf16.vlgmr.msra.gmra.mxu2 %v438_v37 }
  0x94   : > { %699 = vmatmul.bf16.vlgmr.msra.gmra.mxu3 %v439_v38 }
  0xa2   : > { %647 = vmatmul.bf16.gmra.mxu0 %v440_v43 }
  0xa3   : > { %666 = vmatmul.bf16.gmra.mxu1 %v441_v44  ;;  %685 = vmatmul.bf16.gmra.mxu2 %v440_v43 }
  0xa4   : > { %704 = vmatmul.bf16.gmra.mxu3 %v441_v44 }
 0x10f   : > { %v643_v45 = vpop.f32.mrf.mxu0 }
 0x110   : > { %v662_v47 = vpop.f32.mrf.mxu1 }
 0x111   : > { %v663_v48 = vadd.f32 %v662_v47, %v643_v45 }
 0x113   : > { %v710_v49 = vadd.f32 %v663_v48, %v422_v46 }
 0x115   : > { %718 = vst [vmem:[#allocation2 + $0x30] sm:$0xff] %v710_v49 }
 0x116   : > { %v681_v50 = vpop.f32.mrf.mxu2 }
 0x117   : > { %v700_v52 = vpop.f32.mrf.mxu3  ;;  %v645_v53 = vpop.f32.mrf.mxu0 }
 0x118   : > { %v701_v54 = vadd.f32 %v700_v52, %v681_v50  ;;  %v664_v56 = vpop.f32.mrf.mxu1 }
 0x119   : > { %v665_v57 = vadd.f32 %v664_v56, %v645_v53 }
 0x11a   : > { %v711_v58 = vadd.f32 %v701_v54, %v423_v51 }
 0x11b   : > { %v712_v59 = vadd.f32 %v665_v57, %v424_v55 }
 0x11c   : > { %719 = vst [vmem:[#allocation2] sm:$0xff] %v711_v58 }
 0x11d   : > { %720 = vst [vmem:[#allocation2 + $0x18] sm:$0xff] %v712_v59 }
 0x11e   : > { %v683_v60 = vpop.f32.mrf.mxu2 }
 0x11f   : > { %v702_v62 = vpop.f32.mrf.mxu3  ;;  %v648_v63 = vpop.f32.mrf.mxu0 }
 0x120   : > { %v703_v0 = vadd.f32 %v702_v62, %v683_v60  ;;  %v667_v2 = vpop.f32.mrf.mxu1 }
 0x121   : > { %v668_v3 = vadd.f32 %v667_v2, %v648_v63 }
 0x122   : > { %v713_v4 = vadd.f32 %v703_v0, %v425_v61 }
 0x123   : > { %v714_v5 = vadd.f32 %v668_v3, %v426_v1 }
 0x124   : > { %721 = vst [vmem:[#allocation2 + $0x10] sm:$0xff] %v713_v4 }
 0x125   : > { %722 = vst [vmem:[#allocation2 + $0x8] sm:$0xff] %v714_v5 }
 0x126   : > { %v686_v6 = vpop.f32.mrf.mxu2 }
 0x127   : > { %v705_v8 = vpop.f32.mrf.mxu3  ;;  %v650_v9 = vpop.f32.mrf.mxu0 }
 0x128   : > { %v706_v10 = vadd.f32 %v705_v8, %v686_v6  ;;  %v669_v12 = vpop.f32.mrf.mxu1 }
 0x129   : > { %v670_v13 = vadd.f32 %v669_v12, %v650_v9 }
 0x12a   : > { %v715_v14 = vadd.f32 %v706_v10, %v427_v7 }
 0x12b   : > { %v716_v15 = vadd.f32 %v670_v13, %v428_v11 }
 0x12c   : > { %723 = vst [vmem:[#allocation2 + $0x20] sm:$0xff] %v715_v14 }
 0x12d   : > { %724 = vst [vmem:[#allocation2 + $0x28] sm:$0xff] %v716_v15 }
 0x12e   : > { %v688_v16 = vpop.f32.mrf.mxu2 }
 0x12f   : > { %v707_v18 = vpop.f32.mrf.mxu3 }
 0x130   : > { %v708_v19 = vadd.f32 %v707_v18, %v688_v16  ;;  %729 = sbr.rel (%p1381_p1) target bundleno = 898 (0x382), region = 76 }
 0x132   : > { %v717_v20 = vadd.f32 %v708_v19, %v429_v17 }
 0x134   : > { %725 = vst [vmem:[#allocation2 + $0x38] sm:$0xff] %v717_v20 }
 0x135   : > { %v1525_v21 = vld [vmem:[#allocation9 + $0x38] sm:$0xff]  ;;  %v1524_v23 = vld [vmem:[#allocation9 + $0x30] sm:$0xff]  ;;  %v1523_v25 = vld [vmem:[#allocation9 + $0x28] sm:$0xff] }
 0x136   : > { %v1533_v22 = vld [vmem:[#allocation9 + $0x78] sm:$0xff]  ;;  %896 = vmatpush.bf16.msra.mxu0 %v1525_v21  ;;  %v1532_v24 = vld [vmem:[#allocation9 + $0x70] sm:$0xff]  ;;  %1543 = vmatpush.bf16.msra.mxu3 %v1525_v21  ;;  %v1531_v26 = vld [vmem:[#allocation9 + $0x68] sm:$0xff] }
 0x137   : > { %915 = vmatpush.bf16.msra.mxu1 %v1533_v22  ;;  %v1522_v27 = vld [vmem:[#allocation9 + $0x20] sm:$0xff]  ;;  %v1521_v29 = vld [vmem:[#allocation9 + $0x18] sm:$0xff]  ;;  %v1520_v32 = vld [vmem:[#allocation9 + $0x10] sm:$0xff] }
 0x138   : > { %v1530_v28 = vld [vmem:[#allocation9 + $0x60] sm:$0xff]  ;;  %v1529_v30 = vld [vmem:[#allocation9 + $0x58] sm:$0xff]  ;;  %v1528_v33 = vld [vmem:[#allocation9 + $0x50] sm:$0xff] }
 0x139   : > { %v738_v31 = vld [vmem:[#allocation8] sm:$0x3]  ;;  %v730_v34 = vld [vmem:[#allocation2 + $0x30] sm:$0xff]  ;;  %v732_v38 = vld [vmem:[#allocation2 + $0x18] sm:$0xff] }
 0x13a   : > { %897 = vmatpush.bf16.msra.mxu0 %v1524_v23  ;;  %1544 = vmatpush.bf16.msra.mxu3 %v1524_v23  ;;  %v740_v35 = vperm.slane %v738_v31, 0  ;;  %v741_v36 = vperm.slane %v738_v31, 1  ;;  %v1541_v37 = vld [vmem:[#allocation11 + $0x38] sm:$0xff]  ;;  %v733_v40 = vld [vmem:[#allocation2 + $0x10] sm:$0xff]  ;;  %v734_v41 = vld [vmem:[#allocation2 + $0x8] sm:$0xff] }
 0x13b   : > { %916 = vmatpush.bf16.msra.mxu1 %v1532_v24  ;;  %v731_v39 = vld [vmem:[#allocation2] sm:$0xff]  ;;  %v736_v42 = vld [vmem:[#allocation2 + $0x28] sm:$0xff]  ;;  %1008 = vmatpush.bf16.msra.mxu2 %v1541_v37  ;;  %v1540_v43 = vld [vmem:[#allocation11 + $0x30] sm:$0xff] }
 0x13c   : > { %v744_v44 = vadd.f32 %v740_v35, %v730_v34  ;;  %v746_v45 = vadd.f32 %v740_v35, %v732_v38  ;;  %v745_v46 = vadd.f32 %v741_v36, %v731_v39  ;;  %v747_v47 = vadd.f32 %v741_v36, %v733_v40  ;;  %v1519_v48 = vld [vmem:[#allocation9 + $0x8] sm:$0xff]  ;;  %v1518_v57 = vld [vmem:[#allocation9] sm:$0xff]  ;;  %v737_v2 = vld [vmem:[#allocation2 + $0x38] sm:$0xff] }
 0x13d   : > { %v1527_v49 = vld [vmem:[#allocation9 + $0x48] sm:$0xff]  ;;  %v748_v50 = vadd.f32 %v740_v35, %v734_v41  ;;  %v750_v51 = vadd.f32 %v740_v35, %v736_v42  ;;  %v1526_v58 = vld [vmem:[#allocation9 + $0x40] sm:$0xff]  ;;  %v751_v4 = vadd.f32 %v741_v36, %v737_v2  ;;  %v1537_v8 = vld [vmem:[#allocation11 + $0x18] sm:$0xff] }
 0x13e   : > { %898 = vmatpush.bf16.msra.mxu0 %v1523_v25  ;;  %1545 = vmatpush.bf16.msra.mxu3 %v1523_v25  ;;  %v1539_v52 = vld [vmem:[#allocation11 + $0x28] sm:$0xff]  ;;  %v752_v53 = vmax.f32 %v744_v44, 0.0  ;;  %v754_v54 = vmax.f32 %v746_v45, 0.0  ;;  %v753_v55 = vmax.f32 %v745_v46, 0.0  ;;  %v755_v56 = vmax.f32 %v747_v47, 0.0  ;;  %v1538_v61 = vld [vmem:[#allocation11 + $0x20] sm:$0xff] }
 0x13f   : > { %917 = vmatpush.bf16.msra.mxu1 %v1531_v26  ;;  %1009 = vmatpush.bf16.msra.mxu2 %v1540_v43  ;;  %v756_v59 = vmax.f32 %v748_v50, 0.0  ;;  %v758_v60 = vmax.f32 %v750_v51, 0.0  ;;  %v735_v1 = vld [vmem:[#allocation2 + $0x20] sm:$0xff]  ;;  %v759_v6 = vmax.f32 %v751_v4, 0.0  ;;  %v1536_v9 = vld [vmem:[#allocation11 + $0x10] sm:$0xff]  ;;  %v1535_v10 = vld [vmem:[#allocation11 + $0x8] sm:$0xff] }
 0x140   : > { %v760_v62 = vpack.c.bf16 %v754_v54, %v752_v53  ;;  %v761_v63 = vpack.c.bf16 %v755_v56, %v753_v55  ;;  %v749_v3 = vadd.f32 %v741_v36, %v735_v1  ;;  %v1534_v11 = vld [vmem:[#allocation11] sm:$0xff]  ;;  %v1723_v14 = vld [vmem:[%s2526_s22] ss:$0 sm:$0xff] }
 0x141   : > { %v762_v0 = vpack.c.bf16 %v758_v60, %v756_v59  ;;  %v1724_v35 = vld [vmem:[%s2527_s10] ss:$0 sm:$0xff] }
 0x142   : > { %899 = vmatpush.bf16.msra.mxu0 %v1522_v27  ;;  %1546 = vmatpush.bf16.msra.mxu3 %v1522_v27  ;;  %v757_v5 = vmax.f32 %v749_v3, 0.0 }
 0x143   : > { %918 = vmatpush.bf16.msra.mxu1 %v1530_v28  ;;  %1010 = vmatpush.bf16.msra.mxu2 %v1539_v52 }
 0x144   : > { %v763_v7 = vpack.c.bf16 %v759_v6, %v757_v5 }
 0x146   : > { %900 = vmatpush.bf16.msra.mxu0 %v1521_v29  ;;  %1547 = vmatpush.bf16.msra.mxu3 %v1521_v29 }
 0x147   : > { %919 = vmatpush.bf16.msra.mxu1 %v1529_v30  ;;  %1011 = vmatpush.bf16.msra.mxu2 %v1538_v61 }
 0x14a   : > { %901 = vmatpush.bf16.msra.mxu0 %v1520_v32  ;;  %1548 = vmatpush.bf16.msra.mxu3 %v1520_v32 }
 0x14b   : > { %920 = vmatpush.bf16.msra.mxu1 %v1528_v33  ;;  %1012 = vmatpush.bf16.msra.mxu2 %v1537_v8 }
 0x14e   : > { %902 = vmatpush.bf16.msra.mxu0 %v1519_v48  ;;  %1549 = vmatpush.bf16.msra.mxu3 %v1519_v48 }
 0x14f   : > { %921 = vmatpush.bf16.msra.mxu1 %v1527_v49  ;;  %1013 = vmatpush.bf16.msra.mxu2 %v1536_v9 }
 0x152   : > { %903 = vmatpush.bf16.msra.mxu0 %v1518_v57  ;;  %1550 = vmatpush.bf16.msra.mxu3 %v1518_v57 }
 0x153   : > { %922 = vmatpush.bf16.msra.mxu1 %v1526_v58  ;;  %1014 = vmatpush.bf16.msra.mxu2 %v1535_v10 }
 0x155   : > { %904 = vmatmul.bf16.vlgmr.msra.gmra.mxu0 %v760_v62  ;;  %909 = vmatmul.bf16.vlgmr.msra.gmra.mxu3 %v762_v0 }
 0x156   : > { %923 = vmatmul.bf16.vlgmr.msra.gmra.mxu1 %v761_v63 }
 0x157   : > { %1015 = vmatpush.bf16.msra.mxu2 %v1534_v11 }
 0x166   : > { %928 = vmatmul.bf16.gmra.mxu1 %v763_v7 }
 0x1d2   : > { %v905_v12 = vpop.f32.mrf.mxu0 }
 0x1d3   : > { %v924_v13 = vpop.f32.mrf.mxu1  ;;  %v906_v15 = vadd.f32 %v1723_v14, %v905_v12 }
 0x1d5   : > { %v925_v18 = vadd.f32 %v924_v13, %v906_v15 }
 0x1d7   : > { %v934_v22 = vmax.f32 %v925_v18, 0.0 }
 0x1d8   : > { %v910_v20 = vpop.f32.mrf.mxu3 }
 0x1d9   : > { %v911_v27 = vadd.f32 %v1723_v14, %v910_v20 }
 0x1da   : > { %v907_v16 = vpop.f32.mrf.mxu0 }
 0x1db   : > { %v926_v17 = vpop.f32.mrf.mxu1  ;;  %v908_v19 = vadd.f32 %v1723_v14, %v907_v16 }
 0x1dd   : > { %v927_v21 = vadd.f32 %v926_v17, %v908_v19 }
 0x1df   : > { %v935_v23 = vmax.f32 %v927_v21, 0.0 }
 0x1e0   : > { %v912_v26 = vpop.f32.mrf.mxu3 }
 0x1e1   : > { %v938_v24 = vpack.c.bf16 %v935_v23, %v934_v22  ;;  %v913_v28 = vadd.f32 %v1723_v14, %v912_v26 }
 0x1e3   : > { %v929_v25 = vpop.f32.mrf.mxu1  ;;  %1016 = vmatmul.bf16.vlgmr.msra.gmra.mxu2 %v938_v24 }
 0x1e4   : > { %v930_v30 = vadd.f32 %v929_v25, %v911_v27 }
 0x1e6   : > { %v936_v33 = vmax.f32 %v930_v30, 0.0 }
 0x1eb   : > { %v931_v29 = vpop.f32.mrf.mxu1 }
 0x1ec   : > { %v932_v31 = vadd.f32 %v931_v29, %v913_v28 }
 0x1ee   : > { %v937_v32 = vmax.f32 %v932_v31, 0.0 }
 0x1f0   : > { %v939_v34 = vpack.c.bf16 %v937_v32, %v936_v33 }
 0x1f3   : > { %1021 = vmatmul.bf16.gmra.mxu2 %v939_v34 }
 0x266   : > { %v1017_v36 = vpop.f32.mrf.mxu2 }
 0x267   : > { %v1018_v37 = vadd.f32 %v1724_v35, %v1017_v36 }
 0x269   : > { %1027 = vmax.xlane.f32.xlu0 %v1018_v37 }
 0x26e   : > { %v1019_v38 = vpop.f32.mrf.mxu2 }
 0x26f   : > { %v1020_v39 = vadd.f32 %v1724_v35, %v1019_v38 }
 0x271   : > { %1029 = vmax.xlane.f32.xlu0 %v1020_v39 }
 0x276   : > { %v1022_v40 = vpop.f32.mrf.mxu2 }
 0x277   : > { %v1023_v41 = vadd.f32 %v1724_v35, %v1022_v40 }
 0x279   : > { %1031 = vmax.xlane.f32.xlu1 %v1023_v41 }
 0x27e   : > { %v1024_v42 = vpop.f32.mrf.mxu2 }
 0x27f   : > { %v1025_v43 = vadd.f32 %v1724_v35, %v1024_v42 }
 0x281   : > { %1033 = vmax.xlane.f32.xlu1 %v1025_v43 }
 0x2dc   : > { %v1028_v44 = vpop.xlane.xlu0 %1027 }
 0x2dd   : > { %v1035_v45 = vsub.f32 %v1018_v37, %v1028_v44 }
 0x2df   : > { %v1039_v46 = vmul.f32 1.442695, %v1035_v45 }
 0x2e1   : > { %1725 = vpow2.f32 %v1039_v46 }
 0x2e4   : > { %v1030_v47 = vpop.xlane.xlu0 %1029 }
 0x2e5   : > { %v1036_v48 = vsub.f32 %v1020_v39, %v1030_v47 }
 0x2e7   : > { %v1726_v49 = vpop.eup %1725  ;;  %v1041_v50 = vmul.f32 1.442695, %v1036_v48 }
 0x2e8   : > { %1047 = vadd.xlane.f32.xlu2 %v1726_v49 }
 0x2e9   : > { %1727 = vpow2.f32 %v1041_v50 }
 0x2ec   : > { %v1032_v51 = vpop.xlane.xlu1 %1031 }
 0x2ed   : > { %v1037_v52 = vsub.f32 %v1023_v41, %v1032_v51 }
 0x2ef   : > { %v1728_v53 = vpop.eup %1727  ;;  %v1043_v54 = vmul.f32 1.442695, %v1037_v52 }
 0x2f0   : > { %1049 = vadd.xlane.f32.xlu2 %v1728_v53 }
 0x2f1   : > { %1729 = vpow2.f32 %v1043_v54 }
 0x2f4   : > { %v1034_v55 = vpop.xlane.xlu1 %1033 }
 0x2f5   : > { %v1038_v56 = vsub.f32 %v1025_v43, %v1034_v55 }
 0x2f7   : > { %v1730_v57 = vpop.eup %1729  ;;  %v1045_v58 = vmul.f32 1.442695, %v1038_v56 }
 0x2f8   : > { %1051 = vadd.xlane.f32.xlu0 %v1730_v57 }
 0x2f9   : > { %1731 = vpow2.f32 %v1045_v58 }
 0x2ff   : > { %v1732_v59 = vpop.eup %1731 }
 0x300   : > { %1053 = vadd.xlane.f32.xlu1 %v1732_v59 }
 0x35b   : > { %v1048_v60 = vpop.xlane.xlu2 %1047 }
 0x35c   : > { %1733 = vlog2.f32 %v1048_v60 }
 0x362   : > { %v1734_v61 = vpop.eup %1733 }
 0x363   : > { %v1056_v62 = vmul.f32 0.6931472, %v1734_v61  ;;  %v1050_v63 = vpop.xlane.xlu2 %1049 }
 0x364   : > { %1735 = vlog2.f32 %v1050_v63 }
 0x365   : > { %v1063_v0 = vadd.f32 %v1056_v62, %v1028_v44 }
 0x367   : > { %v1067_v1 = vsub.f32 %v1018_v37, %v1063_v0 }
 0x369   : > { %1071 = vst [vmem:[%s2322_s27] sm:$0xff] %v1067_v1 }
 0x36a   : > { %v1736_v2 = vpop.eup %1735 }
 0x36b   : > { %v1058_v3 = vmul.f32 0.6931472, %v1736_v2  ;;  %v1052_v4 = vpop.xlane.xlu0 %1051 }
 0x36c   : > { %1737 = vlog2.f32 %v1052_v4 }
 0x36d   : > { %v1064_v5 = vadd.f32 %v1058_v3, %v1030_v47 }
 0x36f   : > { %v1068_v6 = vsub.f32 %v1020_v39, %v1064_v5 }
 0x371   : > { %1072 = vst [vmem:[%s2322_s27 + $0x8] sm:$0xff] %v1068_v6 }
 0x372   : > { %v1738_v7 = vpop.eup %1737 }
 0x373   : > { %v1060_v8 = vmul.f32 0.6931472, %v1738_v7  ;;  %v1054_v9 = vpop.xlane.xlu1 %1053 }
 0x374   : > { %1739 = vlog2.f32 %v1054_v9 }
 0x375   : > { %v1065_v10 = vadd.f32 %v1060_v8, %v1032_v51 }
 0x377   : > { %v1069_v11 = vsub.f32 %v1023_v41, %v1065_v10 }
 0x379   : > { %1073 = vst [vmem:[%s2322_s27 + $0x10] sm:$0xff] %v1069_v11 }
 0x37a   : > { %v1740_v12 = vpop.eup %1739 }
 0x37b   : > { %v1062_v13 = vmul.f32 0.6931472, %v1740_v12 }
 0x37d   : > { %v1066_v14 = vadd.f32 %v1062_v13, %v1034_v55 }
 0x37f   : > { %v1070_v15 = vsub.f32 %v1025_v43, %v1066_v14 }
 0x381   : > { %1074 = vst [vmem:[%s2322_s27 + $0x18] sm:$0xff] %v1070_v15 }
 0x382 PF: > { %s2528_s13 = sld [smem:[#allocation21_spill]]  ;;  %s1088_s0 = sshll.u32 %s2322_s27, 4  ;;  %s1089_s0 = int_to_ptr.vmem [resolvable:$true] %s1088_s0 }
 0x383   : > { %s2530_s7 = sld [smem:[#allocation35_spill]]  ;;  %s1076_s30 = scalar_lea.sflag [#allocation5], %s403_s18 }
 0x388   : > { %s1542_s6 = sshll.u32 %s2528_s13, 5 }
 0x389   : > { %s1087_s9 = scalar_lea.hbm %s2530_s7, %s1542_s6  ;;  %s1911_s3 = scalar_lea.hbm %s2530_s7, 64 }
 0x38a   : > { %s1090_s16 = sshll.u32 %s1087_s9, 4  ;;  %s1091_s16 = int_to_ptr.hbm [resolvable:$true] %s1090_s16 }
 0x38b   : > { %s1905_s4 = sshra.s32 %s1091_s16, 4  ;;  %s1906_s4 = int_to_ptr.hbm [resolvable:$true] %s1905_s4 }
 0x38c   : > { %s1907_s17 = scalar_lea.hbm %s1906_s4, 32  ;;  %p1912_p10 = scmp.lt.s32.totalorder %s1906_s4, %s2530_s7 }
 0x38d   : > { %p1908_p5 = scmp.ne.s32.totalorder %s1906_s4, %s1907_s17  ;;  %p1913_p0 = scmp.lt.s32.totalorder %s1911_s3, %s1907_s17 }
 0x38f   : > { %p1909_p13 = pnand %p1908_p5, %p2195_p9  ;;  %p1914_p4 = por %p1913_p0, %p1912_p10 }
 0x391   : > { %p1910_p7 = pneg %p1909_p13 }
 0x393   : > { %p1915_p6 = pnand %p1914_p4, %p1910_p7 }
 0x395   : > { %1918 = shalt.err (!%p1915_p6)
}
 0x396   : > { %s2062_s18 = smov 128   ;;  %s2063_s27 = smov 8  }
 0x397   : > { %1567 = dma.vmem_to_hbm [thread:$0]  (%p2195_p9), %s1089_s0, 512, %s1091_s16, %s1076_s30, %s2062_s18, %s2062_s18, %s2063_s27  }
 0x398 PF: > { %s2531_s24 = sld [smem:[#allocation18_spill]]  ;;  %p1597_p8 = scmp.ge.s32.totalorder %s2049_s14, 2 }
 0x39a   : > { %p1587_p2 = pnand %p1597_p8, %p2200_p11 }
 0x39c   : > { %p1588_p12 = pneg %p1587_p2 }
 0x39e   : > { %s1105_s10 = sand.u32 1, %s2531_s24  }
 0x39f   : > { %s1106_s13 = scalar_lea.sflag [#allocation5], %s1105_s10 }
 0x3a0   : > { %1992 = dma.done.wait (%p1588_p12), %s1106_s13, 512  }
 0x3a1   : > { %1994 = vsyncadd (%p1588_p12), %s1106_s13, 4294966784  ;;  %s27_s14 = sadd.s32 1, %s2049_s14   ;;  %s2534_s2 = sld [smem:[#allocation27_spill]] }
 0x3a2   : > { %p2430_p3 = scmp.ge.s32.totalorder %s27_s14, 6   ;;  %s2535_s5 = sld [smem:[#allocation19_spill]] }
 0x3a3   : > { %s2536_s9 = sld [smem:[#allocation28_spill]]  ;;  %s2540_s24 = smov %s2001_s25 }
 0x3a4   : > { %s2537_s11 = sld [smem:[#allocation22_spill]]  ;;  %s2541_s25 = smov %s2005_s26 }
 0x3a5   : > { %s2538_s20 = sld [smem:[#allocation25_spill]]  ;;  %s2543_s27 = smov %s2013_s28 }
 0x3a6   : > { %s2539_s13 = sld [smem:[#allocation26_spill]]  ;;  %s2544_s28 = smov %s2017_s29 }
 0x3a7   : > { %s2542_s26 = smov %s2534_s2  ;;  %s2545_s29 = smov %s2283_s23 }
 0x3a8   : > { %s2546_s30 = smov %s2025_s8  ;;  %s2547_s8 = smov %s2535_s5 }
 0x3a9   : > { %s2548_s10 = smov %s2041_s12  ;;  %26 = sbr.rel (!%p2430_p3) target bundleno = 21 (0x15), region = 126 }
 0x3ab   : > { %s2549_s12 = smov %s2538_s20 }
 0x3ae   :  { %1112 = vsyncpa [#allocation4], 1 }
 0x3af   :  { %1114 = vsyncpa [#allocation4 + $0x1], 1 }
 0x3b0   :  { %1115 = vsyncpa [#allocation7], 1 }
 0x3b1   :  { %1117 = vsyncpa [#allocation7 + $0x1], 1 }
 0x3b2   :  { %1118 = vsyncpa [#allocation10], 1 }
 0x3b3   :  { %1119 = vsyncpa [#allocation5], 1 }
 0x3b4   :  { %1121 = vsyncpa [#allocation5 + $0x1], 1 }

</bundles_post_ra>
